<compile_context>
chip_gen: v7x
topology: tpu7x:2x2x1
jax: 0.10.0
libtpu: 0.0.40
codegen_flags: <defaults>
</compile_context>

<pallas_src>
import jax
import jax.numpy as jnp
import numpy as np
from jax.experimental import pallas as pl
from jax.experimental.pallas import tpu as pltpu

# ---- module hyper-parameters (match the torch KANLayer defaults) ----------
IN_FEATURES = 32
OUT_FEATURES = 64
GRID_SIZE = 5
SPLINE_ORDER = 3
K = GRID_SIZE + SPLINE_ORDER            # spline basis functions / feature = 8
G2 = GRID_SIZE + 2 * SPLINE_ORDER + 1   # knots per feature = 12
CIN = (K + 1) * IN_FEATURES             # fused contraction depth = 288
MAX_TN = 512                            # rows (lanes) per tile, upper bound


def kan_kernel(x_ref, grid_ref, rden_ref, w_ref, o_ref):
    """One tile of the KAN forward in transposed (feature-on-sublane) layout.

    x_ref:    (IN, TN)    input rows, batch on lanes
    grid_ref: (IN, G2)    knot positions
    rden_ref: (IN, 3*G2)  precomputed 1/(knot_diff + 1e-8) per recursion level
    w_ref:    (OUT, (K+1)*IN) fused [base | spline(k-major)] weight
    o_ref:    (OUT, TN)   output rows, batch on lanes (lane-dense stores)
    """
    x = x_ref[...].astype(jnp.float32)                 # (IN, TN)
    g = grid_ref[...].astype(jnp.float32)              # (IN, G2)
    rd = rden_ref[...]                                 # (IN, 3*G2)

    # Hoisted knot differences: each knot is broadcast against the tile once
    # and reused across all recursion levels (JAX does not CSE broadcasts).
    dif = [x - g[:, j:j + 1] for j in range(G2)]       # each (IN, TN)

    # order-0 basis: 1[grid_j <= x < grid_{j+1}]  (== dif_j>=0 & dif_{j+1}<0)
    bases = [
        jnp.logical_and(dif[j] >= 0.0, dif[j + 1] < 0.0).astype(jnp.float32)
        for j in range(G2 - 1)
    ]

    # Cox-de Boor recursion with precomputed reciprocal denominators
    # (matches torch b_splines incl. the +1e-8, but multiply instead of divide)
    for k in range(1, SPLINE_ORDER + 1):
        off = (k - 1) * G2
        rc = [rd[:, off + m:off + m + 1] for m in range(G2 - k)]  # each (IN,1)
        bases = [
            dif[j] * (rc[j] * bases[j])
            - dif[j + k + 1] * (rc[j + 1] * bases[j + 1])
            for j in range(len(bases) - 1)
        ]
    # len(bases) == K, each (IN, TN)

    # base branch: SiLU(x).  exp runs on the EUP; one exact divide per tile
    # keeps full precision and is negligible next to the recursion.
    act = x * (1.0 / (1.0 + jnp.exp(-x)))

    # fused MXU matmul: features = [SiLU(x); B_0..B_{K-1}] -> ((K+1)*IN, TN)
    feats = jnp.concatenate([act] + bases, axis=0)
    out = jnp.dot(w_ref[...], feats, preferred_element_type=jnp.float32)
    o_ref[...] = out.astype(o_ref.dtype)               # (OUT, TN)


def _row_tile(n_rows):
    """Rows (lanes) per grid step: large enough to amortize the ~0.35us/step
    grid overhead, a multiple of 128 for lane-dense stores, and >=2 grid steps
    whenever there is enough work so a megacore can split the parallel axis."""
    n128 = ((n_rows + 127) // 128) * 128
    tn = min(MAX_TN, n128)
    if n128 >= 256 and n128 // tn < 2:
        tn = max(128, (n128 // 256) * 128)
    return tn


@jax.jit
def kan_forward(x, grid, base_weight, spline_weight, spline_scaler):
    orig_shape = x.shape
    xf = x.reshape(-1, IN_FEATURES)
    n = xf.shape[0]
    tn = _row_tile(n)
    n_pad = ((n + tn - 1) // tn) * tn
    if n_pad != n:
        xf = jnp.pad(xf, ((0, n_pad - n), (0, 0)))
    x_t = xf.T                                          # (IN, n_pad) layout plumbing

    # ---- glue: grid-only precompute + weight layout (no hot-path compute) ----
    # fused weight [ base | spline (k-major) ] -> (OUT, (K+1)*IN)
    scaled_sw = spline_weight * spline_scaler[..., None]          # (OUT, IN, K)
    sw_kmaj = jnp.transpose(scaled_sw, (0, 2, 1)).reshape(
        OUT_FEATURES, K * IN_FEATURES)                            # col = k*IN + i
    w_full = jnp.concatenate(
        [base_weight.astype(jnp.float32), sw_kmaj.astype(jnp.float32)], axis=1)

    # reciprocal Cox-de Boor denominators:
    # rden[:, (k-1)*G2 + m] = 1 / (grid[:, m+k] - grid[:, m] + 1e-8)
    gf = grid.astype(jnp.float32)
    rden_parts = []
    for k in range(1, SPLINE_ORDER + 1):
        delta = gf[:, k:] - gf[:, :-k]                            # (IN, G2-k)
        rden_parts.append(jnp.concatenate(
            [1.0 / (delta + 1e-8), jnp.zeros((IN_FEATURES, k), jnp.float32)],
            axis=1))
    rden = jnp.concatenate(rden_parts, axis=1)                    # (IN, 3*G2)

    flops = 2 * n_pad * OUT_FEATURES * CIN + 14 * n_pad * IN_FEATURES * G2
    cost = pl.CostEstimate(
        flops=flops,
        transcendentals=n_pad * IN_FEATURES,
        bytes_accessed=4 * (n_pad * (IN_FEATURES + OUT_FEATURES)
                            + OUT_FEATURES * CIN
                            + IN_FEATURES * G2 * (1 + SPLINE_ORDER)))

    out_t = pl.pallas_call(
        kan_kernel,
        out_shape=jax.ShapeDtypeStruct((OUT_FEATURES, n_pad), x.dtype),
        grid_spec=pltpu.PrefetchScalarGridSpec(
            num_scalar_prefetch=0,
            grid=(n_pad // tn,),
            in_specs=[
                pl.BlockSpec((IN_FEATURES, tn), lambda i: (0, i)),
                pl.BlockSpec((IN_FEATURES, G2), lambda i: (0, 0)),
                pl.BlockSpec((IN_FEATURES, SPLINE_ORDER * G2), lambda i: (0, 0)),
                pl.BlockSpec((OUT_FEATURES, CIN), lambda i: (0, 0)),
            ],
            out_specs=pl.BlockSpec((OUT_FEATURES, tn), lambda i: (0, i)),
        ),
        compiler_params=pltpu.CompilerParams(
            dimension_semantics=("parallel",)),
        cost_estimate=cost,
    )(x_t, gf, rden, w_full)

    out = out_t.T[:n]                                   # drop padded rows
    return out.reshape(*orig_shape[:-1], OUT_FEATURES)


def kan_reference(x, grid, base_weight, spline_weight, spline_scaler):
    """Pure-JAX mirror of the torch forward (for verification)."""
    xf = x.reshape(-1, IN_FEATURES)
    act = xf * jax.nn.sigmoid(xf)
    base_out = act @ base_weight.T
    g = grid[None]                       # (1, IN, G2)
    xe = xf[:, :, None]                  # (N, IN, 1)
    bases = ((xe >= g[:, :, :-1]) & (xe < g[:, :, 1:])).astype(xf.dtype)
    for k in range(1, SPLINE_ORDER + 1):
        t1 = ((xe - g[:, :, :-(k + 1)])
              / (g[:, :, k:-1] - g[:, :, :-(k + 1)] + 1e-8) * bases[:, :, :-1])
        t2 = ((g[:, :, k + 1:] - xe)
              / (g[:, :, k + 1:] - g[:, :, 1:-k] + 1e-8) * bases[:, :, 1:])
        bases = t1 + t2
    sw = (spline_weight * spline_scaler[..., None]).reshape(OUT_FEATURES, -1)
    spline_out = bases.reshape(xf.shape[0], -1) @ sw.T
    out = base_out + spline_out
    return out.reshape(*x.shape[:-1], OUT_FEATURES)


if __name__ == "__main__":
    key = jax.random.PRNGKey(0)
    k1, k2, k3, k4, k5 = jax.random.split(key, 5)

    # grid buffer: (in_features, grid_size + 2*spline_order + 1), uniform knots
    h = (1.0 - (-1.0)) / GRID_SIZE
    knots = (jnp.arange(-SPLINE_ORDER, GRID_SIZE + SPLINE_ORDER + 1,
                        dtype=jnp.float32) * h - 1.0)
    grid = jnp.broadcast_to(knots, (IN_FEATURES, G2))

    # deterministic synthetic parameters (same shapes as the torch module);
    # TODO(synk): curve2coeff / kaiming-uniform init are init-time only (torch
    # lstsq), replaced here by deterministic uniform draws of the same shapes.
    bound = 1.0 / np.sqrt(IN_FEATURES)
    base_weight = jax.random.uniform(
        k1, (OUT_FEATURES, IN_FEATURES), jnp.float32, -bound, bound)
    spline_weight = jax.random.uniform(
        k2, (OUT_FEATURES, IN_FEATURES, K), jnp.float32, -0.1, 0.1)
    spline_scaler = jax.random.uniform(
        k3, (OUT_FEATURES, IN_FEATURES), jnp.float32, -bound, bound)

    # small input: (batch=2, seq=8, in_features=32)
    x = jax.random.uniform(k4, (2, 8, IN_FEATURES), jnp.float32, -1.0, 1.0)
    out = kan_forward(x, grid, base_weight, spline_weight, spline_scaler)
    out = jax.block_until_ready(out)
    assert out.shape == (2, 8, OUT_FEATURES)
    ref = kan_reference(x, grid, base_weight, spline_weight, spline_scaler)
    np.testing.assert_allclose(np.asarray(out), np.asarray(ref),
                               rtol=1e-4, atol=1e-4)

    # second check: exercises row padding + a multi-step grid (2 tiles of 128)
    x2 = jax.random.uniform(k5, (2, 100, IN_FEATURES), jnp.float32, -1.0, 1.0)
    out2 = jax.block_until_ready(
        kan_forward(x2, grid, base_weight, spline_weight, spline_scaler))
    ref2 = kan_reference(x2, grid, base_weight, spline_weight, spline_scaler)
    np.testing.assert_allclose(np.asarray(out2), np.asarray(ref2),
                               rtol=1e-4, atol=1e-4)

    print("KERNEL_OK")
</pallas_src>

<mosaic_0001>
module attributes {stable_mosaic.version = 11 : i64} {
  func.func @kan_kernel(%arg0: i32, %arg1: memref<32x128xf32, #tpu.memory_space<vmem>>, %arg2: memref<32x12xf32, #tpu.memory_space<vmem>>, %arg3: memref<32x36xf32, #tpu.memory_space<vmem>>, %arg4: memref<64x288xf32, #tpu.memory_space<vmem>>, %arg5: memref<64x128xf32, #tpu.memory_space<vmem>>) attributes {dimension_semantics = [#tpu.dimension_semantics<parallel>], iteration_bounds = array<i64: 1>, scalar_prefetch = 0 : i64, scratch_operands = 0 : i64, tpu.core_type = #tpu.core_type<tc>, window_params = [{transform_indices = @transform_0, window_bounds = array<i64: 32, 128>}, {pipeline_mode = #tpu.pipeline_mode<synchronous>, transform_indices = @transform_1, window_bounds = array<i64: 32, 12>}, {pipeline_mode = #tpu.pipeline_mode<synchronous>, transform_indices = @transform_2, window_bounds = array<i64: 32, 36>}, {pipeline_mode = #tpu.pipeline_mode<synchronous>, transform_indices = @transform_3, window_bounds = array<i64: 64, 288>}, {transform_indices = @transform_4, window_bounds = array<i64: 64, 128>}]} {
    %c0 = arith.constant 0 : index
    %c0_0 = arith.constant 0 : index
    %0 = vector.load %arg1[%c0, %c0_0] : memref<32x128xf32, #tpu.memory_space<vmem>>, vector<32x128xf32>
    %c0_1 = arith.constant 0 : index
    %c0_2 = arith.constant 0 : index
    %1 = vector.load %arg2[%c0_1, %c0_2] : memref<32x12xf32, #tpu.memory_space<vmem>>, vector<32x12xf32>
    %c0_3 = arith.constant 0 : index
    %c0_4 = arith.constant 0 : index
    %2 = vector.load %arg3[%c0_3, %c0_4] : memref<32x36xf32, #tpu.memory_space<vmem>>, vector<32x36xf32>
    %3 = vector.extract_strided_slice %1 {offsets = [0, 0], sizes = [32, 1], strides = [1, 1]} : vector<32x12xf32> to vector<32x1xf32>
    %4 = vector.broadcast %3 : vector<32x1xf32> to vector<32x128xf32>
    %5 = arith.subf %0, %4 : vector<32x128xf32>
    %6 = vector.extract_strided_slice %1 {offsets = [0, 1], sizes = [32, 1], strides = [1, 1]} : vector<32x12xf32> to vector<32x1xf32>
    %7 = vector.broadcast %6 : vector<32x1xf32> to vector<32x128xf32>
    %8 = arith.subf %0, %7 : vector<32x128xf32>
    %9 = vector.extract_strided_slice %1 {offsets = [0, 2], sizes = [32, 1], strides = [1, 1]} : vector<32x12xf32> to vector<32x1xf32>
    %10 = vector.broadcast %9 : vector<32x1xf32> to vector<32x128xf32>
    %11 = arith.subf %0, %10 : vector<32x128xf32>
    %12 = vector.extract_strided_slice %1 {offsets = [0, 3], sizes = [32, 1], strides = [1, 1]} : vector<32x12xf32> to vector<32x1xf32>
    %13 = vector.broadcast %12 : vector<32x1xf32> to vector<32x128xf32>
    %14 = arith.subf %0, %13 : vector<32x128xf32>
    %15 = vector.extract_strided_slice %1 {offsets = [0, 4], sizes = [32, 1], strides = [1, 1]} : vector<32x12xf32> to vector<32x1xf32>
    %16 = vector.broadcast %15 : vector<32x1xf32> to vector<32x128xf32>
    %17 = arith.subf %0, %16 : vector<32x128xf32>
    %18 = vector.extract_strided_slice %1 {offsets = [0, 5], sizes = [32, 1], strides = [1, 1]} : vector<32x12xf32> to vector<32x1xf32>
    %19 = vector.broadcast %18 : vector<32x1xf32> to vector<32x128xf32>
    %20 = arith.subf %0, %19 : vector<32x128xf32>
    %21 = vector.extract_strided_slice %1 {offsets = [0, 6], sizes = [32, 1], strides = [1, 1]} : vector<32x12xf32> to vector<32x1xf32>
    %22 = vector.broadcast %21 : vector<32x1xf32> to vector<32x128xf32>
    %23 = arith.subf %0, %22 : vector<32x128xf32>
    %24 = vector.extract_strided_slice %1 {offsets = [0, 7], sizes = [32, 1], strides = [1, 1]} : vector<32x12xf32> to vector<32x1xf32>
    %25 = vector.broadcast %24 : vector<32x1xf32> to vector<32x128xf32>
    %26 = arith.subf %0, %25 : vector<32x128xf32>
    %27 = vector.extract_strided_slice %1 {offsets = [0, 8], sizes = [32, 1], strides = [1, 1]} : vector<32x12xf32> to vector<32x1xf32>
    %28 = vector.broadcast %27 : vector<32x1xf32> to vector<32x128xf32>
    %29 = arith.subf %0, %28 : vector<32x128xf32>
    %30 = vector.extract_strided_slice %1 {offsets = [0, 9], sizes = [32, 1], strides = [1, 1]} : vector<32x12xf32> to vector<32x1xf32>
    %31 = vector.broadcast %30 : vector<32x1xf32> to vector<32x128xf32>
    %32 = arith.subf %0, %31 : vector<32x128xf32>
    %33 = vector.extract_strided_slice %1 {offsets = [0, 10], sizes = [32, 1], strides = [1, 1]} : vector<32x12xf32> to vector<32x1xf32>
    %34 = vector.broadcast %33 : vector<32x1xf32> to vector<32x128xf32>
    %35 = arith.subf %0, %34 : vector<32x128xf32>
    %36 = vector.extract_strided_slice %1 {offsets = [0, 11], sizes = [32, 1], strides = [1, 1]} : vector<32x12xf32> to vector<32x1xf32>
    %37 = vector.broadcast %36 : vector<32x1xf32> to vector<32x128xf32>
    %38 = arith.subf %0, %37 : vector<32x128xf32>
    %cst = arith.constant 0.000000e+00 : f32
    %39 = vector.broadcast %cst : f32 to vector<32x128xf32>
    %40 = arith.cmpf oge, %5, %39 : vector<32x128xf32>
    %cst_5 = arith.constant 0.000000e+00 : f32
    %41 = vector.broadcast %cst_5 : f32 to vector<32x128xf32>
    %42 = arith.cmpf olt, %8, %41 : vector<32x128xf32>
    %43 = arith.andi %40, %42 : vector<32x128xi1>
    %44 = arith.extui %43 : vector<32x128xi1> to vector<32x128xi32>
    %45 = arith.sitofp %44 : vector<32x128xi32> to vector<32x128xf32>
    %cst_6 = arith.constant 0.000000e+00 : f32
    %46 = vector.broadcast %cst_6 : f32 to vector<32x128xf32>
    %47 = arith.cmpf oge, %8, %46 : vector<32x128xf32>
    %cst_7 = arith.constant 0.000000e+00 : f32
    %48 = vector.broadcast %cst_7 : f32 to vector<32x128xf32>
    %49 = arith.cmpf olt, %11, %48 : vector<32x128xf32>
    %50 = arith.andi %47, %49 : vector<32x128xi1>
    %51 = arith.extui %50 : vector<32x128xi1> to vector<32x128xi32>
    %52 = arith.sitofp %51 : vector<32x128xi32> to vector<32x128xf32>
    %cst_8 = arith.constant 0.000000e+00 : f32
    %53 = vector.broadcast %cst_8 : f32 to vector<32x128xf32>
    %54 = arith.cmpf oge, %11, %53 : vector<32x128xf32>
    %cst_9 = arith.constant 0.000000e+00 : f32
    %55 = vector.broadcast %cst_9 : f32 to vector<32x128xf32>
    %56 = arith.cmpf olt, %14, %55 : vector<32x128xf32>
    %57 = arith.andi %54, %56 : vector<32x128xi1>
    %58 = arith.extui %57 : vector<32x128xi1> to vector<32x128xi32>
    %59 = arith.sitofp %58 : vector<32x128xi32> to vector<32x128xf32>
    %cst_10 = arith.constant 0.000000e+00 : f32
    %60 = vector.broadcast %cst_10 : f32 to vector<32x128xf32>
    %61 = arith.cmpf oge, %14, %60 : vector<32x128xf32>
    %cst_11 = arith.constant 0.000000e+00 : f32
    %62 = vector.broadcast %cst_11 : f32 to vector<32x128xf32>
    %63 = arith.cmpf olt, %17, %62 : vector<32x128xf32>
    %64 = arith.andi %61, %63 : vector<32x128xi1>
    %65 = arith.extui %64 : vector<32x128xi1> to vector<32x128xi32>
    %66 = arith.sitofp %65 : vector<32x128xi32> to vector<32x128xf32>
    %cst_12 = arith.constant 0.000000e+00 : f32
    %67 = vector.broadcast %cst_12 : f32 to vector<32x128xf32>
    %68 = arith.cmpf oge, %17, %67 : vector<32x128xf32>
    %cst_13 = arith.constant 0.000000e+00 : f32
    %69 = vector.broadcast %cst_13 : f32 to vector<32x128xf32>
    %70 = arith.cmpf olt, %20, %69 : vector<32x128xf32>
    %71 = arith.andi %68, %70 : vector<32x128xi1>
    %72 = arith.extui %71 : vector<32x128xi1> to vector<32x128xi32>
    %73 = arith.sitofp %72 : vector<32x128xi32> to vector<32x128xf32>
    %cst_14 = arith.constant 0.000000e+00 : f32
    %74 = vector.broadcast %cst_14 : f32 to vector<32x128xf32>
    %75 = arith.cmpf oge, %20, %74 : vector<32x128xf32>
    %cst_15 = arith.constant 0.000000e+00 : f32
    %76 = vector.broadcast %cst_15 : f32 to vector<32x128xf32>
    %77 = arith.cmpf olt, %23, %76 : vector<32x128xf32>
    %78 = arith.andi %75, %77 : vector<32x128xi1>
    %79 = arith.extui %78 : vector<32x128xi1> to vector<32x128xi32>
    %80 = arith.sitofp %79 : vector<32x128xi32> to vector<32x128xf32>
    %cst_16 = arith.constant 0.000000e+00 : f32
    %81 = vector.broadcast %cst_16 : f32 to vector<32x128xf32>
    %82 = arith.cmpf oge, %23, %81 : vector<32x128xf32>
    %cst_17 = arith.constant 0.000000e+00 : f32
    %83 = vector.broadcast %cst_17 : f32 to vector<32x128xf32>
    %84 = arith.cmpf olt, %26, %83 : vector<32x128xf32>
    %85 = arith.andi %82, %84 : vector<32x128xi1>
    %86 = arith.extui %85 : vector<32x128xi1> to vector<32x128xi32>
    %87 = arith.sitofp %86 : vector<32x128xi32> to vector<32x128xf32>
    %cst_18 = arith.constant 0.000000e+00 : f32
    %88 = vector.broadcast %cst_18 : f32 to vector<32x128xf32>
    %89 = arith.cmpf oge, %26, %88 : vector<32x128xf32>
    %cst_19 = arith.constant 0.000000e+00 : f32
    %90 = vector.broadcast %cst_19 : f32 to vector<32x128xf32>
    %91 = arith.cmpf olt, %29, %90 : vector<32x128xf32>
    %92 = arith.andi %89, %91 : vector<32x128xi1>
    %93 = arith.extui %92 : vector<32x128xi1> to vector<32x128xi32>
    %94 = arith.sitofp %93 : vector<32x128xi32> to vector<32x128xf32>
    %cst_20 = arith.constant 0.000000e+00 : f32
    %95 = vector.broadcast %cst_20 : f32 to vector<32x128xf32>
    %96 = arith.cmpf oge, %29, %95 : vector<32x128xf32>
    %cst_21 = arith.constant 0.000000e+00 : f32
    %97 = vector.broadcast %cst_21 : f32 to vector<32x128xf32>
    %98 = arith.cmpf olt, %32, %97 : vector<32x128xf32>
    %99 = arith.andi %96, %98 : vector<32x128xi1>
    %100 = arith.extui %99 : vector<32x128xi1> to vector<32x128xi32>
    %101 = arith.sitofp %100 : vector<32x128xi32> to vector<32x128xf32>
    %cst_22 = arith.constant 0.000000e+00 : f32
    %102 = vector.broadcast %cst_22 : f32 to vector<32x128xf32>
    %103 = arith.cmpf oge, %32, %102 : vector<32x128xf32>
    %cst_23 = arith.constant 0.000000e+00 : f32
    %104 = vector.broadcast %cst_23 : f32 to vector<32x128xf32>
    %105 = arith.cmpf olt, %35, %104 : vector<32x128xf32>
    %106 = arith.andi %103, %105 : vector<32x128xi1>
    %107 = arith.extui %106 : vector<32x128xi1> to vector<32x128xi32>
    %108 = arith.sitofp %107 : vector<32x128xi32> to vector<32x128xf32>
    %cst_24 = arith.constant 0.000000e+00 : f32
    %109 = vector.broadcast %cst_24 : f32 to vector<32x128xf32>
    %110 = arith.cmpf oge, %35, %109 : vector<32x128xf32>
    %cst_25 = arith.constant 0.000000e+00 : f32
    %111 = vector.broadcast %cst_25 : f32 to vector<32x128xf32>
    %112 = arith.cmpf olt, %38, %111 : vector<32x128xf32>
    %113 = arith.andi %110, %112 : vector<32x128xi1>
    %114 = arith.extui %113 : vector<32x128xi1> to vector<32x128xi32>
    %115 = arith.sitofp %114 : vector<32x128xi32> to vector<32x128xf32>
    %116 = vector.extract_strided_slice %2 {offsets = [0, 0], sizes = [32, 1], strides = [1, 1]} : vector<32x36xf32> to vector<32x1xf32>
    %117 = vector.extract_strided_slice %2 {offsets = [0, 1], sizes = [32, 1], strides = [1, 1]} : vector<32x36xf32> to vector<32x1xf32>
    %118 = vector.extract_strided_slice %2 {offsets = [0, 2], sizes = [32, 1], strides = [1, 1]} : vector<32x36xf32> to vector<32x1xf32>
    %119 = vector.extract_strided_slice %2 {offsets = [0, 3], sizes = [32, 1], strides = [1, 1]} : vector<32x36xf32> to vector<32x1xf32>
    %120 = vector.extract_strided_slice %2 {offsets = [0, 4], sizes = [32, 1], strides = [1, 1]} : vector<32x36xf32> to vector<32x1xf32>
    %121 = vector.extract_strided_slice %2 {offsets = [0, 5], sizes = [32, 1], strides = [1, 1]} : vector<32x36xf32> to vector<32x1xf32>
    %122 = vector.extract_strided_slice %2 {offsets = [0, 6], sizes = [32, 1], strides = [1, 1]} : vector<32x36xf32> to vector<32x1xf32>
    %123 = vector.extract_strided_slice %2 {offsets = [0, 7], sizes = [32, 1], strides = [1, 1]} : vector<32x36xf32> to vector<32x1xf32>
    %124 = vector.extract_strided_slice %2 {offsets = [0, 8], sizes = [32, 1], strides = [1, 1]} : vector<32x36xf32> to vector<32x1xf32>
    %125 = vector.extract_strided_slice %2 {offsets = [0, 9], sizes = [32, 1], strides = [1, 1]} : vector<32x36xf32> to vector<32x1xf32>
    %126 = vector.extract_strided_slice %2 {offsets = [0, 10], sizes = [32, 1], strides = [1, 1]} : vector<32x36xf32> to vector<32x1xf32>
    %127 = vector.broadcast %116 : vector<32x1xf32> to vector<32x128xf32>
    %128 = arith.mulf %127, %45 : vector<32x128xf32>
    %129 = arith.mulf %5, %128 : vector<32x128xf32>
    %130 = vector.broadcast %117 : vector<32x1xf32> to vector<32x128xf32>
    %131 = arith.mulf %130, %52 : vector<32x128xf32>
    %132 = arith.mulf %11, %131 : vector<32x128xf32>
    %133 = arith.subf %129, %132 : vector<32x128xf32>
    %134 = vector.broadcast %117 : vector<32x1xf32> to vector<32x128xf32>
    %135 = arith.mulf %134, %52 : vector<32x128xf32>
    %136 = arith.mulf %8, %135 : vector<32x128xf32>
    %137 = vector.broadcast %118 : vector<32x1xf32> to vector<32x128xf32>
    %138 = arith.mulf %137, %59 : vector<32x128xf32>
    %139 = arith.mulf %14, %138 : vector<32x128xf32>
    %140 = arith.subf %136, %139 : vector<32x128xf32>
    %141 = vector.broadcast %118 : vector<32x1xf32> to vector<32x128xf32>
    %142 = arith.mulf %141, %59 : vector<32x128xf32>
    %143 = arith.mulf %11, %142 : vector<32x128xf32>
    %144 = vector.broadcast %119 : vector<32x1xf32> to vector<32x128xf32>
    %145 = arith.mulf %144, %66 : vector<32x128xf32>
    %146 = arith.mulf %17, %145 : vector<32x128xf32>
    %147 = arith.subf %143, %146 : vector<32x128xf32>
    %148 = vector.broadcast %119 : vector<32x1xf32> to vector<32x128xf32>
    %149 = arith.mulf %148, %66 : vector<32x128xf32>
    %150 = arith.mulf %14, %149 : vector<32x128xf32>
    %151 = vector.broadcast %120 : vector<32x1xf32> to vector<32x128xf32>
    %152 = arith.mulf %151, %73 : vector<32x128xf32>
    %153 = arith.mulf %20, %152 : vector<32x128xf32>
    %154 = arith.subf %150, %153 : vector<32x128xf32>
    %155 = vector.broadcast %120 : vector<32x1xf32> to vector<32x128xf32>
    %156 = arith.mulf %155, %73 : vector<32x128xf32>
    %157 = arith.mulf %17, %156 : vector<32x128xf32>
    %158 = vector.broadcast %121 : vector<32x1xf32> to vector<32x128xf32>
    %159 = arith.mulf %158, %80 : vector<32x128xf32>
    %160 = arith.mulf %23, %159 : vector<32x128xf32>
    %161 = arith.subf %157, %160 : vector<32x128xf32>
    %162 = vector.broadcast %121 : vector<32x1xf32> to vector<32x128xf32>
    %163 = arith.mulf %162, %80 : vector<32x128xf32>
    %164 = arith.mulf %20, %163 : vector<32x128xf32>
    %165 = vector.broadcast %122 : vector<32x1xf32> to vector<32x128xf32>
    %166 = arith.mulf %165, %87 : vector<32x128xf32>
    %167 = arith.mulf %26, %166 : vector<32x128xf32>
    %168 = arith.subf %164, %167 : vector<32x128xf32>
    %169 = vector.broadcast %122 : vector<32x1xf32> to vector<32x128xf32>
    %170 = arith.mulf %169, %87 : vector<32x128xf32>
    %171 = arith.mulf %23, %170 : vector<32x128xf32>
    %172 = vector.broadcast %123 : vector<32x1xf32> to vector<32x128xf32>
    %173 = arith.mulf %172, %94 : vector<32x128xf32>
    %174 = arith.mulf %29, %173 : vector<32x128xf32>
    %175 = arith.subf %171, %174 : vector<32x128xf32>
    %176 = vector.broadcast %123 : vector<32x1xf32> to vector<32x128xf32>
    %177 = arith.mulf %176, %94 : vector<32x128xf32>
    %178 = arith.mulf %26, %177 : vector<32x128xf32>
    %179 = vector.broadcast %124 : vector<32x1xf32> to vector<32x128xf32>
    %180 = arith.mulf %179, %101 : vector<32x128xf32>
    %181 = arith.mulf %32, %180 : vector<32x128xf32>
    %182 = arith.subf %178, %181 : vector<32x128xf32>
    %183 = vector.broadcast %124 : vector<32x1xf32> to vector<32x128xf32>
    %184 = arith.mulf %183, %101 : vector<32x128xf32>
    %185 = arith.mulf %29, %184 : vector<32x128xf32>
    %186 = vector.broadcast %125 : vector<32x1xf32> to vector<32x128xf32>
    %187 = arith.mulf %186, %108 : vector<32x128xf32>
    %188 = arith.mulf %35, %187 : vector<32x128xf32>
    %189 = arith.subf %185, %188 : vector<32x128xf32>
    %190 = vector.broadcast %125 : vector<32x1xf32> to vector<32x128xf32>
    %191 = arith.mulf %190, %108 : vector<32x128xf32>
    %192 = arith.mulf %32, %191 : vector<32x128xf32>
    %193 = vector.broadcast %126 : vector<32x1xf32> to vector<32x128xf32>
    %194 = arith.mulf %193, %115 : vector<32x128xf32>
    %195 = arith.mulf %38, %194 : vector<32x128xf32>
    %196 = arith.subf %192, %195 : vector<32x128xf32>
    %197 = vector.extract_strided_slice %2 {offsets = [0, 12], sizes = [32, 1], strides = [1, 1]} : vector<32x36xf32> to vector<32x1xf32>
    %198 = vector.extract_strided_slice %2 {offsets = [0, 13], sizes = [32, 1], strides = [1, 1]} : vector<32x36xf32> to vector<32x1xf32>
    %199 = vector.extract_strided_slice %2 {offsets = [0, 14], sizes = [32, 1], strides = [1, 1]} : vector<32x36xf32> to vector<32x1xf32>
    %200 = vector.extract_strided_slice %2 {offsets = [0, 15], sizes = [32, 1], strides = [1, 1]} : vector<32x36xf32> to vector<32x1xf32>
    %201 = vector.extract_strided_slice %2 {offsets = [0, 16], sizes = [32, 1], strides = [1, 1]} : vector<32x36xf32> to vector<32x1xf32>
    %202 = vector.extract_strided_slice %2 {offsets = [0, 17], sizes = [32, 1], strides = [1, 1]} : vector<32x36xf32> to vector<32x1xf32>
    %203 = vector.extract_strided_slice %2 {offsets = [0, 18], sizes = [32, 1], strides = [1, 1]} : vector<32x36xf32> to vector<32x1xf32>
    %204 = vector.extract_strided_slice %2 {offsets = [0, 19], sizes = [32, 1], strides = [1, 1]} : vector<32x36xf32> to vector<32x1xf32>
    %205 = vector.extract_strided_slice %2 {offsets = [0, 20], sizes = [32, 1], strides = [1, 1]} : vector<32x36xf32> to vector<32x1xf32>
    %206 = vector.extract_strided_slice %2 {offsets = [0, 21], sizes = [32, 1], strides = [1, 1]} : vector<32x36xf32> to vector<32x1xf32>
    %207 = vector.broadcast %197 : vector<32x1xf32> to vector<32x128xf32>
    %208 = arith.mulf %207, %133 : vector<32x128xf32>
    %209 = arith.mulf %5, %208 : vector<32x128xf32>
    %210 = vector.broadcast %198 : vector<32x1xf32> to vector<32x128xf32>
    %211 = arith.mulf %210, %140 : vector<32x128xf32>
    %212 = arith.mulf %14, %211 : vector<32x128xf32>
    %213 = arith.subf %209, %212 : vector<32x128xf32>
    %214 = vector.broadcast %198 : vector<32x1xf32> to vector<32x128xf32>
    %215 = arith.mulf %214, %140 : vector<32x128xf32>
    %216 = arith.mulf %8, %215 : vector<32x128xf32>
    %217 = vector.broadcast %199 : vector<32x1xf32> to vector<32x128xf32>
    %218 = arith.mulf %217, %147 : vector<32x128xf32>
    %219 = arith.mulf %17, %218 : vector<32x128xf32>
    %220 = arith.subf %216, %219 : vector<32x128xf32>
    %221 = vector.broadcast %199 : vector<32x1xf32> to vector<32x128xf32>
    %222 = arith.mulf %221, %147 : vector<32x128xf32>
    %223 = arith.mulf %11, %222 : vector<32x128xf32>
    %224 = vector.broadcast %200 : vector<32x1xf32> to vector<32x128xf32>
    %225 = arith.mulf %224, %154 : vector<32x128xf32>
    %226 = arith.mulf %20, %225 : vector<32x128xf32>
    %227 = arith.subf %223, %226 : vector<32x128xf32>
    %228 = vector.broadcast %200 : vector<32x1xf32> to vector<32x128xf32>
    %229 = arith.mulf %228, %154 : vector<32x128xf32>
    %230 = arith.mulf %14, %229 : vector<32x128xf32>
    %231 = vector.broadcast %201 : vector<32x1xf32> to vector<32x128xf32>
    %232 = arith.mulf %231, %161 : vector<32x128xf32>
    %233 = arith.mulf %23, %232 : vector<32x128xf32>
    %234 = arith.subf %230, %233 : vector<32x128xf32>
    %235 = vector.broadcast %201 : vector<32x1xf32> to vector<32x128xf32>
    %236 = arith.mulf %235, %161 : vector<32x128xf32>
    %237 = arith.mulf %17, %236 : vector<32x128xf32>
    %238 = vector.broadcast %202 : vector<32x1xf32> to vector<32x128xf32>
    %239 = arith.mulf %238, %168 : vector<32x128xf32>
    %240 = arith.mulf %26, %239 : vector<32x128xf32>
    %241 = arith.subf %237, %240 : vector<32x128xf32>
    %242 = vector.broadcast %202 : vector<32x1xf32> to vector<32x128xf32>
    %243 = arith.mulf %242, %168 : vector<32x128xf32>
    %244 = arith.mulf %20, %243 : vector<32x128xf32>
    %245 = vector.broadcast %203 : vector<32x1xf32> to vector<32x128xf32>
    %246 = arith.mulf %245, %175 : vector<32x128xf32>
    %247 = arith.mulf %29, %246 : vector<32x128xf32>
    %248 = arith.subf %244, %247 : vector<32x128xf32>
    %249 = vector.broadcast %203 : vector<32x1xf32> to vector<32x128xf32>
    %250 = arith.mulf %249, %175 : vector<32x128xf32>
    %251 = arith.mulf %23, %250 : vector<32x128xf32>
    %252 = vector.broadcast %204 : vector<32x1xf32> to vector<32x128xf32>
    %253 = arith.mulf %252, %182 : vector<32x128xf32>
    %254 = arith.mulf %32, %253 : vector<32x128xf32>
    %255 = arith.subf %251, %254 : vector<32x128xf32>
    %256 = vector.broadcast %204 : vector<32x1xf32> to vector<32x128xf32>
    %257 = arith.mulf %256, %182 : vector<32x128xf32>
    %258 = arith.mulf %26, %257 : vector<32x128xf32>
    %259 = vector.broadcast %205 : vector<32x1xf32> to vector<32x128xf32>
    %260 = arith.mulf %259, %189 : vector<32x128xf32>
    %261 = arith.mulf %35, %260 : vector<32x128xf32>
    %262 = arith.subf %258, %261 : vector<32x128xf32>
    %263 = vector.broadcast %205 : vector<32x1xf32> to vector<32x128xf32>
    %264 = arith.mulf %263, %189 : vector<32x128xf32>
    %265 = arith.mulf %29, %264 : vector<32x128xf32>
    %266 = vector.broadcast %206 : vector<32x1xf32> to vector<32x128xf32>
    %267 = arith.mulf %266, %196 : vector<32x128xf32>
    %268 = arith.mulf %38, %267 : vector<32x128xf32>
    %269 = arith.subf %265, %268 : vector<32x128xf32>
    %270 = vector.extract_strided_slice %2 {offsets = [0, 24], sizes = [32, 1], strides = [1, 1]} : vector<32x36xf32> to vector<32x1xf32>
    %271 = vector.extract_strided_slice %2 {offsets = [0, 25], sizes = [32, 1], strides = [1, 1]} : vector<32x36xf32> to vector<32x1xf32>
    %272 = vector.extract_strided_slice %2 {offsets = [0, 26], sizes = [32, 1], strides = [1, 1]} : vector<32x36xf32> to vector<32x1xf32>
    %273 = vector.extract_strided_slice %2 {offsets = [0, 27], sizes = [32, 1], strides = [1, 1]} : vector<32x36xf32> to vector<32x1xf32>
    %274 = vector.extract_strided_slice %2 {offsets = [0, 28], sizes = [32, 1], strides = [1, 1]} : vector<32x36xf32> to vector<32x1xf32>
    %275 = vector.extract_strided_slice %2 {offsets = [0, 29], sizes = [32, 1], strides = [1, 1]} : vector<32x36xf32> to vector<32x1xf32>
    %276 = vector.extract_strided_slice %2 {offsets = [0, 30], sizes = [32, 1], strides = [1, 1]} : vector<32x36xf32> to vector<32x1xf32>
    %277 = vector.extract_strided_slice %2 {offsets = [0, 31], sizes = [32, 1], strides = [1, 1]} : vector<32x36xf32> to vector<32x1xf32>
    %278 = vector.extract_strided_slice %2 {offsets = [0, 32], sizes = [32, 1], strides = [1, 1]} : vector<32x36xf32> to vector<32x1xf32>
    %279 = vector.broadcast %270 : vector<32x1xf32> to vector<32x128xf32>
    %280 = arith.mulf %279, %213 : vector<32x128xf32>
    %281 = arith.mulf %5, %280 : vector<32x128xf32>
    %282 = vector.broadcast %271 : vector<32x1xf32> to vector<32x128xf32>
    %283 = arith.mulf %282, %220 : vector<32x128xf32>
    %284 = arith.mulf %17, %283 : vector<32x128xf32>
    %285 = arith.subf %281, %284 : vector<32x128xf32>
    %286 = vector.broadcast %271 : vector<32x1xf32> to vector<32x128xf32>
    %287 = arith.mulf %286, %220 : vector<32x128xf32>
    %288 = arith.mulf %8, %287 : vector<32x128xf32>
    %289 = vector.broadcast %272 : vector<32x1xf32> to vector<32x128xf32>
    %290 = arith.mulf %289, %227 : vector<32x128xf32>
    %291 = arith.mulf %20, %290 : vector<32x128xf32>
    %292 = arith.subf %288, %291 : vector<32x128xf32>
    %293 = vector.broadcast %272 : vector<32x1xf32> to vector<32x128xf32>
    %294 = arith.mulf %293, %227 : vector<32x128xf32>
    %295 = arith.mulf %11, %294 : vector<32x128xf32>
    %296 = vector.broadcast %273 : vector<32x1xf32> to vector<32x128xf32>
    %297 = arith.mulf %296, %234 : vector<32x128xf32>
    %298 = arith.mulf %23, %297 : vector<32x128xf32>
    %299 = arith.subf %295, %298 : vector<32x128xf32>
    %300 = vector.broadcast %273 : vector<32x1xf32> to vector<32x128xf32>
    %301 = arith.mulf %300, %234 : vector<32x128xf32>
    %302 = arith.mulf %14, %301 : vector<32x128xf32>
    %303 = vector.broadcast %274 : vector<32x1xf32> to vector<32x128xf32>
    %304 = arith.mulf %303, %241 : vector<32x128xf32>
    %305 = arith.mulf %26, %304 : vector<32x128xf32>
    %306 = arith.subf %302, %305 : vector<32x128xf32>
    %307 = vector.broadcast %274 : vector<32x1xf32> to vector<32x128xf32>
    %308 = arith.mulf %307, %241 : vector<32x128xf32>
    %309 = arith.mulf %17, %308 : vector<32x128xf32>
    %310 = vector.broadcast %275 : vector<32x1xf32> to vector<32x128xf32>
    %311 = arith.mulf %310, %248 : vector<32x128xf32>
    %312 = arith.mulf %29, %311 : vector<32x128xf32>
    %313 = arith.subf %309, %312 : vector<32x128xf32>
    %314 = vector.broadcast %275 : vector<32x1xf32> to vector<32x128xf32>
    %315 = arith.mulf %314, %248 : vector<32x128xf32>
    %316 = arith.mulf %20, %315 : vector<32x128xf32>
    %317 = vector.broadcast %276 : vector<32x1xf32> to vector<32x128xf32>
    %318 = arith.mulf %317, %255 : vector<32x128xf32>
    %319 = arith.mulf %32, %318 : vector<32x128xf32>
    %320 = arith.subf %316, %319 : vector<32x128xf32>
    %321 = vector.broadcast %276 : vector<32x1xf32> to vector<32x128xf32>
    %322 = arith.mulf %321, %255 : vector<32x128xf32>
    %323 = arith.mulf %23, %322 : vector<32x128xf32>
    %324 = vector.broadcast %277 : vector<32x1xf32> to vector<32x128xf32>
    %325 = arith.mulf %324, %262 : vector<32x128xf32>
    %326 = arith.mulf %35, %325 : vector<32x128xf32>
    %327 = arith.subf %323, %326 : vector<32x128xf32>
    %328 = vector.broadcast %277 : vector<32x1xf32> to vector<32x128xf32>
    %329 = arith.mulf %328, %262 : vector<32x128xf32>
    %330 = arith.mulf %26, %329 : vector<32x128xf32>
    %331 = vector.broadcast %278 : vector<32x1xf32> to vector<32x128xf32>
    %332 = arith.mulf %331, %269 : vector<32x128xf32>
    %333 = arith.mulf %38, %332 : vector<32x128xf32>
    %334 = arith.subf %330, %333 : vector<32x128xf32>
    %cst_26 = arith.constant 0.000000e+00 : f32
    %335 = vector.broadcast %cst_26 : f32 to vector<32x128xf32>
    %336 = arith.subf %335, %0 : vector<32x128xf32>
    %337 = math.exp %336 : vector<32x128xf32>
    %cst_27 = arith.constant 1.000000e+00 : f32
    %338 = vector.broadcast %cst_27 : f32 to vector<32x128xf32>
    %339 = arith.addf %338, %337 : vector<32x128xf32>
    %cst_28 = arith.constant 1.000000e+00 : f32
    %340 = vector.broadcast %cst_28 : f32 to vector<32x128xf32>
    %341 = arith.divf %340, %339 : vector<32x128xf32>
    %342 = arith.mulf %0, %341 : vector<32x128xf32>
    %343 = tpu.concatenate %342, %285, %292, %299, %306, %313, %320, %327, %334 in 0 : vector<32x128xf32>, vector<32x128xf32>, vector<32x128xf32>, vector<32x128xf32>, vector<32x128xf32>, vector<32x128xf32>, vector<32x128xf32>, vector<32x128xf32>, vector<32x128xf32> -> vector<288x128xf32>
    %c0_29 = arith.constant 0 : index
    %c0_30 = arith.constant 0 : index
    %344 = vector.load %arg4[%c0_29, %c0_30] : memref<64x288xf32, #tpu.memory_space<vmem>>, vector<64x288xf32>
    %cst_31 = arith.constant dense<0.000000e+00> : vector<64x128xf32>
    %345 = tpu.matmul %344, %343, %cst_31 {dimension_numbers = #tpu.dot_dimension_numbers<[1], [0], [0], [1], [0, 0, 1, 1], [], []>} : vector<64x288xf32>, vector<288x128xf32>, vector<64x128xf32> -> vector<64x128xf32>
    %c0_32 = arith.constant 0 : index
    %c0_33 = arith.constant 0 : index
    %346 = vector.load %arg5[%c0_32, %c0_33] : memref<64x128xf32, #tpu.memory_space<vmem>>, vector<64x128xf32>
    tpu.vector_store %arg5[%c0_32, %c0_33], %345 {strides = array<i32>} : memref<64x128xf32, #tpu.memory_space<vmem>>, vector<64x128xf32>,
    return
  }
  func.func @transform_0(%arg0: i32) -> (i32, i32) {
    %c0_i32 = arith.constant 0 : i32
    %c0_i32_0 = arith.constant 0 : i32
    return %c0_i32, %arg0 : i32, i32
  }
  func.func @transform_1(%arg0: i32) -> (i32, i32) {
    %c0_i32 = arith.constant 0 : i32
    %c0_i32_0 = arith.constant 0 : i32
    %c0_i32_1 = arith.constant 0 : i32
    return %c0_i32, %c0_i32_0 : i32, i32
  }
  func.func @transform_2(%arg0: i32) -> (i32, i32) {
    %c0_i32 = arith.constant 0 : i32
    %c0_i32_0 = arith.constant 0 : i32
    %c0_i32_1 = arith.constant 0 : i32
    return %c0_i32, %c0_i32_0 : i32, i32
  }
  func.func @transform_3(%arg0: i32) -> (i32, i32) {
    %c0_i32 = arith.constant 0 : i32
    %c0_i32_0 = arith.constant 0 : i32
    %c0_i32_1 = arith.constant 0 : i32
    return %c0_i32, %c0_i32_0 : i32, i32
  }
  func.func @transform_4(%arg0: i32) -> (i32, i32) {
    %c0_i32 = arith.constant 0 : i32
    %c0_i32_0 = arith.constant 0 : i32
    return %c0_i32, %arg0 : i32, i32
  }
}

</mosaic_0001>

<bundles_post_ra>
// kernel: kan_forward.1
= control target key start
LH: loop header
LB: loop body
LE: loop exit
PB: predicated region body
PF: predicated region fallthrough
CT: control target
= control target key end

     0   :  { %v2063_v0 = vmov 11   ;;  %v2064_v1 = vmov 0   ;;  %v2065_v6 = vmov 1   ;;  %v2066_v8 = vmov 2   ;;  %s3943_s1 = inlined_call_operand.vmem [shape: f32[32,12], index: 1, kind: input, shape index: {}]   ;;  %s3944_s2 = inlined_call_operand.vmem [shape: f32[32,36], index: 2, kind: input, shape index: {}]   ;;  %s3945_s0 = inlined_call_operand.vmem [shape: f32[32,128], index: 0, kind: input, shape index: {}]   ;;  %s3946_s3 = inlined_call_operand.vmem [shape: f32[64,288], index: 3, kind: input, shape index: {}]   ;;  %s3947_s4 = inlined_call_operand.vmem [shape: f32[64,128], index: 4, kind: output, shape index: {}]  }
   0x1   :  { %1959 = vset.pattern.permute.xlu0 %v2063_v0  ;;  %1948 = vset.pattern.permute.xlu1 %v2064_v1  ;;  %v2125_v2 = vld [vmem:[%s3943_s1 + $0x10] sm:$0xff]  ;;  %v2130_v3 = vld [vmem:[%s3943_s1] sm:$0xff]  ;;  %v2137_v4 = vld [vmem:[%s3943_s1 + $0x18] sm:$0xff]  ;;  %v2067_v10 = vmov 3   ;;  %v2068_v12 = vmov 4   ;;  %v2069_v13 = vmov 5  }
   0x2   :  { %41 = vperm.xlu1 %1948, %v2125_v2   ;;  %254 = vperm.xlu0 %1959, %v2130_v3   ;;  %v2144_v5 = vld [vmem:[%s3943_s1 + $0x8] sm:$0xff]  ;;  %v2168_v9 = vld [vmem:[%s3944_s2] sm:$0xff]  ;;  %v2176_v11 = vld [vmem:[%s3944_s2 + $0x18] sm:$0xff]  ;;  %v2070_v14 = vmov 6   ;;  %v2071_v15 = vmov 7   ;;  %v3958_v16 = vmov 8  }
   0x3   :  { %v2155_v7 = vld [vmem:[%s3944_s2 + $0x8] sm:$0xff]  ;;  %v3948_v17 = vmov 9   ;;  %v3973_v18 = vmov 10   ;;  %v2075_v19 = vmov 15   ;;  %v2235_v20 = vld [vmem:[%s3944_s2 + $0x10] sm:$0xff]  ;;  %v2076_v21 = vmov 16  }
   0x4   :  { %v3975_v26 = vmov 27   ;;  %v3967_v29 = vmov 12   ;;  %v3971_v36 = vmov 28   ;;  %v3969_v42 = vmov 18  }
   0x5   :  { %v3963_v45 = vmov 13   ;;  %v3961_v51 = vmov 14   ;;  %v3956_v54 = vmov 29   ;;  %v3950_v57 = vmov 19  }
   0x6   :  { %46 = vperm.xlu1 %1948, %v2137_v4   ;;  %266 = vperm.xlu0 %1959, %v2137_v4   ;;  %v3954_v60 = vmov 24  }
   0xa   :  { %1949 = vset.pattern.permute.xlu1 %v2065_v6  ;;  %1961 = vset.pattern.permute.xlu0 %v2064_v1 }
   0xb   :  { %58 = vperm.xlu1 %1949, %v2144_v5   ;;  %31 = vperm.xlu0 %1961, %v2130_v3  }
   0xf   :  { %62 = vperm.xlu1 %1949, %v2125_v2   ;;  %36 = vperm.xlu0 %1961, %v2144_v5  }
  0x13   :  { %1950 = vset.pattern.permute.xlu1 %v2066_v8  ;;  %500 = vperm.xlu0 %1961, %v2155_v7  }
  0x14   :  { %74 = vperm.xlu1 %1950, %v2130_v3  }
  0x17   :  { %1963 = vset.pattern.permute.xlu0 %v2065_v6 }
  0x18   :  { %54 = vperm.xlu0 %1963, %v2130_v3   ;;  %82 = vperm.xlu1 %1950, %v2125_v2  }
  0x1c   :  { %66 = vperm.xlu0 %1963, %v2137_v4   ;;  %86 = vperm.xlu1 %1950, %v2137_v4  }
  0x20   :  { %522 = vperm.xlu0 %1963, %v2168_v9   ;;  %1951 = vset.pattern.permute.xlu1 %v2067_v10 }
  0x21   :  { %98 = vperm.xlu1 %1951, %v2144_v5  }
  0x24   :  { %534 = vperm.xlu0 %1963, %v2176_v11  }
  0x25   :  { %102 = vperm.xlu1 %1951, %v2125_v2  }
  0x28   :  { %1965 = vset.pattern.permute.xlu0 %v2066_v8 }
  0x29   :  { %78 = vperm.xlu0 %1965, %v2144_v5   ;;  %1952 = vset.pattern.permute.xlu1 %v2068_v12 }
  0x2a   :  { %114 = vperm.xlu1 %1952, %v2130_v3  }
  0x2d   :  { %558 = vperm.xlu0 %1965, %v2155_v7  }
  0x2e   :  { %122 = vperm.xlu1 %1952, %v2125_v2  }
  0x31   :  { %1967 = vset.pattern.permute.xlu0 %v2067_v10 }
  0x32   :  { %94 = vperm.xlu0 %1967, %v2130_v3   ;;  %126 = vperm.xlu1 %1952, %v2137_v4  }
  0x36   :  { %106 = vperm.xlu0 %1967, %v2137_v4   ;;  %1953 = vset.pattern.permute.xlu1 %v2069_v13 }
  0x37   :  { %138 = vperm.xlu1 %1953, %v2144_v5  }
  0x3a   :  { %586 = vperm.xlu0 %1967, %v2168_v9  }
  0x3b   :  { %142 = vperm.xlu1 %1953, %v2125_v2  }
  0x3e   :  { %598 = vperm.xlu0 %1967, %v2176_v11  }
  0x3f   :  { %1954 = vset.pattern.permute.xlu1 %v2070_v14 }
  0x40   :  { %154 = vperm.xlu1 %1954, %v2130_v3  }
  0x42   :  { %1969 = vset.pattern.permute.xlu0 %v2068_v12 }
  0x43   :  { %118 = vperm.xlu0 %1969, %v2144_v5  }
  0x44   :  { %162 = vperm.xlu1 %1954, %v2125_v2  }
  0x47   :  { %622 = vperm.xlu0 %1969, %v2155_v7  }
  0x48   :  { %166 = vperm.xlu1 %1954, %v2137_v4  }
  0x4b   :  { %1971 = vset.pattern.permute.xlu0 %v2069_v13 }
  0x4c   :  { %134 = vperm.xlu0 %1971, %v2130_v3   ;;  %1955 = vset.pattern.permute.xlu1 %v2071_v15 }
  0x4d   :  { %178 = vperm.xlu1 %1955, %v2144_v5  }
  0x50   :  { %146 = vperm.xlu0 %1971, %v2137_v4  }
  0x51   :  { %182 = vperm.xlu1 %1955, %v2125_v2  }
  0x54   :  { %650 = vperm.xlu0 %1971, %v2168_v9  }
  0x55   :  { %1956 = vset.pattern.permute.xlu1 %v3958_v16 }
  0x56   :  { %194 = vperm.xlu1 %1956, %v2130_v3  }
  0x58   :  { %662 = vperm.xlu0 %1971, %v2176_v11  }
  0x5a   :  { %202 = vperm.xlu1 %1956, %v2125_v2  }
  0x5c   :  { %1973 = vset.pattern.permute.xlu0 %v2070_v14 }
  0x5d   :  { %158 = vperm.xlu0 %1973, %v2144_v5  }
  0x5e   :  { %206 = vperm.xlu1 %1956, %v2137_v4  }
  0x61   :  { %686 = vperm.xlu0 %1973, %v2155_v7  }
  0x62   :  { %1957 = vset.pattern.permute.xlu1 %v3948_v17 }
  0x63   :  { %218 = vperm.xlu1 %1957, %v2144_v5  }
  0x65   :  { %1975 = vset.pattern.permute.xlu0 %v2071_v15 }
  0x66   :  { %174 = vperm.xlu0 %1975, %v2130_v3  }
  0x67   :  { %222 = vperm.xlu1 %1957, %v2125_v2  }
  0x6a   :  { %186 = vperm.xlu0 %1975, %v2137_v4  }
  0x6b   :  { %1958 = vset.pattern.permute.xlu1 %v3973_v18 }
  0x6c   :  { %234 = vperm.xlu1 %1958, %v2130_v3  }
  0x6e   :  { %714 = vperm.xlu0 %1975, %v2168_v9  }
  0x70   :  { %242 = vperm.xlu1 %1958, %v2125_v2  }
  0x72   :  { %726 = vperm.xlu0 %1975, %v2176_v11  }
  0x74   :  { %246 = vperm.xlu1 %1958, %v2137_v4  }
  0x76   :  { %1978 = vset.pattern.permute.xlu0 %v2075_v19 }
  0x77   :  { %926 = vperm.xlu0 %1978, %v2168_v9  }
  0x78   :  { %1960 = vset.pattern.permute.xlu1 %v2063_v0 }
  0x79   :  { %258 = vperm.xlu1 %1960, %v2144_v5  }
  0x7b   :  { %934 = vperm.xlu0 %1978, %v2235_v20  }
  0x7d   :  { %262 = vperm.xlu1 %1960, %v2125_v2  }
  0x7f   :  { %1982 = vset.pattern.permute.xlu0 %v2076_v21 }
  0x80   :  { %962 = vperm.xlu0 %1982, %v2155_v7  }
  0x81   :  { %v2242_v22 = vpop.permute.xlu1 %41  ;;  %1962 = vset.pattern.permute.xlu1 %v2064_v1  ;;  %v2245_v23 = vpop.permute.xlu0 %254  ;;  %v3952_v1 = vmov 25  }
  0x82   :  { %4055 = vst [vmem:[#allocation2_spill] sm:$0xff] %v2242_v22  ;;  %4056 = vst [vmem:[#allocation3_spill] sm:$0xff] %v2245_v23  ;;  %495 = vperm.xlu1 %1962, %v2168_v9   ;;  %v4088_v23 = vmov 18  }
  0x84   :  { %970 = vperm.xlu0 %1982, %v2176_v11  }
  0x85   :  { %v2249_v24 = vpop.permute.xlu1 %46  ;;  %v2251_v25 = vpop.permute.xlu0 %266 }
  0x86   :  { %4057 = vst [vmem:[#allocation4_spill] sm:$0xff] %v2249_v24  ;;  %4058 = vst [vmem:[#allocation5_spill] sm:$0xff] %v2251_v25  ;;  %505 = vperm.xlu1 %1962, %v2235_v20   ;;  %v4085_v25 = vmov 28  }
  0x88   :  { %1986 = vset.pattern.permute.xlu0 %v3975_v26 }
  0x89   :  { %1234 = vperm.xlu0 %1986, %v2168_v9  }
  0x8a   :  { %v2256_v27 = vpop.permute.xlu1 %58  ;;  %v2258_v28 = vpop.permute.xlu0 %31  ;;  %510 = vperm.xlu1 %1962, %v2176_v11  }
  0x8b   :  { %4059 = vst [vmem:[#allocation6_spill] sm:$0xff] %v2256_v27 }
  0x8d   :  { %1990 = vset.pattern.permute.xlu0 %v3967_v29 }
  0x8e   :  { %v2262_v30 = vpop.permute.xlu1 %62  ;;  %838 = vperm.xlu0 %1990, %v2168_v9   ;;  %v2265_v31 = vpop.permute.xlu0 %36  ;;  %1964 = vset.pattern.permute.xlu1 %v2065_v6 }
  0x8f   :  { %4060 = vst [vmem:[#allocation7_spill] sm:$0xff] %v2262_v30  ;;  %4061 = vst [vmem:[#allocation8_spill] sm:$0xff] %v2265_v31  ;;  %526 = vperm.xlu1 %1964, %v2155_v7   ;;  %v4095_v30 = vmov 13  }
  0x92   :  { %1991 = vset.pattern.permute.xlu0 %v3958_v16  ;;  %v2270_v32 = vpop.permute.xlu0 %500 }
  0x93   :  { %4062 = vst [vmem:[#allocation9_spill] sm:$0xff] %v2270_v32  ;;  %198 = vperm.xlu0 %1991, %v2144_v5   ;;  %530 = vperm.xlu1 %1964, %v2235_v20   ;;  %v2274_v33 = vpop.permute.xlu1 %74 }
  0x97   :  { %750 = vperm.xlu0 %1991, %v2155_v7   ;;  %v2277_v34 = vpop.permute.xlu0 %54  ;;  %1966 = vset.pattern.permute.xlu1 %v2066_v8  ;;  %v2280_v35 = vpop.permute.xlu1 %82 }
  0x98   :  { %4063 = vst [vmem:[#allocation10_spill] sm:$0xff] %v2280_v35  ;;  %554 = vperm.xlu1 %1966, %v2168_v9  }
  0x9b   :  { %1995 = vset.pattern.permute.xlu0 %v3971_v36  ;;  %v2284_v37 = vpop.permute.xlu0 %66  ;;  %v2286_v38 = vpop.permute.xlu1 %86 }
  0x9c   :  { %4064 = vst [vmem:[#allocation11_spill] sm:$0xff] %v2284_v37  ;;  %1270 = vperm.xlu0 %1995, %v2155_v7   ;;  %562 = vperm.xlu1 %1966, %v2235_v20  }
  0x9f   :  { %v2290_v39 = vpop.permute.xlu0 %522 }
  0xa0   :  { %4065 = vst [vmem:[#allocation12_spill] sm:$0xff] %v2290_v39  ;;  %1274 = vperm.xlu0 %1995, %v2235_v20   ;;  %566 = vperm.xlu1 %1966, %v2176_v11   ;;  %v2294_v40 = vpop.permute.xlu1 %98 }
  0xa3   :  { %v2296_v41 = vpop.permute.xlu0 %534 }
  0xa4   :  { %4066 = vst [vmem:[#allocation13_spill] sm:$0xff] %v2296_v41  ;;  %1999 = vset.pattern.permute.xlu0 %v3969_v42  ;;  %1968 = vset.pattern.permute.xlu1 %v2067_v10  ;;  %v2300_v43 = vpop.permute.xlu1 %102 }
  0xa5   :  { %4067 = vst [vmem:[#allocation14_spill] sm:$0xff] %v2300_v43  ;;  %1034 = vperm.xlu0 %1999, %v2176_v11   ;;  %590 = vperm.xlu1 %1968, %v2155_v7  }
  0xa8   :  { %v2304_v44 = vpop.permute.xlu0 %78 }
  0xa9   :  { %4068 = vst [vmem:[#allocation15_spill] sm:$0xff] %v2304_v44  ;;  %2000 = vset.pattern.permute.xlu0 %v3963_v45  ;;  %594 = vperm.xlu1 %1968, %v2235_v20   ;;  %v2308_v46 = vpop.permute.xlu1 %114 }
  0xaa   :  { %866 = vperm.xlu0 %2000, %v2155_v7  }
  0xac   :  { %v2311_v47 = vpop.permute.xlu0 %558 }
  0xad   :  { %4069 = vst [vmem:[#allocation16_spill] sm:$0xff] %v2311_v47  ;;  %1970 = vset.pattern.permute.xlu1 %v2068_v12  ;;  %v2314_v48 = vpop.permute.xlu1 %122 }
  0xae   :  { %4070 = vst [vmem:[#allocation17_spill] sm:$0xff] %v2314_v48  ;;  %870 = vperm.xlu0 %2000, %v2235_v20   ;;  %618 = vperm.xlu1 %1970, %v2168_v9   ;;  %v4135_v48 = vmov 25  }
  0xb1   :  { %v2318_v49 = vpop.permute.xlu0 %94  ;;  %v2320_v50 = vpop.permute.xlu1 %126 }
  0xb2   :  { %2004 = vset.pattern.permute.xlu0 %v3961_v51  ;;  %626 = vperm.xlu1 %1970, %v2235_v20  }
  0xb3   :  { %906 = vperm.xlu0 %2004, %v2176_v11  }
  0xb5   :  { %v2325_v52 = vpop.permute.xlu0 %106 }
  0xb6   :  { %630 = vperm.xlu1 %1970, %v2176_v11   ;;  %v2328_v53 = vpop.permute.xlu1 %138 }
  0xb7   :  { %2006 = vset.pattern.permute.xlu0 %v3956_v54  ;;  %v2088_v54 = vmov 17  }
  0xb8   :  { %1298 = vperm.xlu0 %2006, %v2168_v9  }
  0xb9   :  { %v2332_v55 = vpop.permute.xlu0 %586 }
  0xba   :  { %1972 = vset.pattern.permute.xlu1 %v2069_v13  ;;  %v2335_v56 = vpop.permute.xlu1 %142 }
  0xbb   :  { %4071 = vst [vmem:[#allocation18_spill] sm:$0xff] %v2335_v56  ;;  %654 = vperm.xlu1 %1972, %v2155_v7  }
  0xbc   :  { %2010 = vset.pattern.permute.xlu0 %v3950_v57 }
  0xbd   :  { %1054 = vperm.xlu0 %2010, %v2168_v9   ;;  %v2340_v58 = vpop.permute.xlu0 %598 }
  0xbf   :  { %658 = vperm.xlu1 %1972, %v2235_v20   ;;  %v2343_v59 = vpop.permute.xlu1 %154 }
  0xc1   :  { %2011 = vset.pattern.permute.xlu0 %v3954_v60 }
  0xc2   :  { %1150 = vperm.xlu0 %2011, %v2155_v7   ;;  %v2347_v61 = vpop.permute.xlu0 %118 }
  0xc3   :  { %1974 = vset.pattern.permute.xlu1 %v2070_v14  ;;  %v2350_v62 = vpop.permute.xlu1 %162 }
  0xc4   :  { %4072 = vst [vmem:[#allocation19_spill] sm:$0xff] %v2350_v62  ;;  %682 = vperm.xlu1 %1974, %v2168_v9  }
  0xc6   :  { %1154 = vperm.xlu0 %2011, %v2235_v20   ;;  %v2354_v63 = vpop.permute.xlu0 %622 }
  0xc7   :  { %v2356_v0 = vpop.permute.xlu1 %166 }
  0xc8   :  { %690 = vperm.xlu1 %1974, %v2235_v20  }
  0xca   :  { %2017 = vset.pattern.permute.xlu0 %v3952_v1 }
  0xcb   :  { %1182 = vperm.xlu0 %2017, %v2176_v11   ;;  %v2361_v2 = vpop.permute.xlu0 %134 }
  0xcc   :  { %694 = vperm.xlu1 %1974, %v2176_v11   ;;  %v2364_v6 = vpop.permute.xlu1 %178 }
  0xcf   :  { %2018 = vset.pattern.permute.xlu0 %v3948_v17  ;;  %v2367_v8 = vpop.permute.xlu0 %146 }
  0xd0   :  { %214 = vperm.xlu0 %2018, %v2130_v3   ;;  %1976 = vset.pattern.permute.xlu1 %v2071_v15  ;;  %v2371_v10 = vpop.permute.xlu1 %182 }
  0xd1   :  { %4073 = vst [vmem:[#allocation20_spill] sm:$0xff] %v2371_v10  ;;  %718 = vperm.xlu1 %1976, %v2155_v7  }
  0xd3   :  { %v2378_v13 = vpop.permute.xlu0 %650 }
  0xd4   :  { %226 = vperm.xlu0 %2018, %v2137_v4   ;;  %v3959_v4 = vmov 30  }
  0xd5   :  { %722 = vperm.xlu1 %1976, %v2235_v20   ;;  %v2376_v12 = vpop.permute.xlu1 %194 }
  0xd7   :  { %v2385_v3 = vpop.permute.xlu0 %662 }
  0xd8   :  { %782 = vperm.xlu0 %2018, %v2155_v7  }
  0xd9   :  { %1977 = vset.pattern.permute.xlu1 %v3958_v16  ;;  %v2382_v14 = vpop.permute.xlu1 %202  ;;  %v3965_v16 = vmov 20  }
  0xda   :  { %4074 = vst [vmem:[#allocation21_spill] sm:$0xff] %v2382_v14  ;;  %746 = vperm.xlu1 %1977, %v2168_v9  }
  0xdc   :  { %786 = vperm.xlu0 %2018, %v2235_v20   ;;  %v2394_v17 = vpop.permute.xlu0 %158 }
  0xdd   :  { %v2388_v15 = vpop.permute.xlu1 %206 }
  0xde   :  { %1979 = vset.pattern.permute.xlu1 %v2075_v19 }
  0xdf   :  { %930 = vperm.xlu1 %1979, %v2155_v7  }
  0xe0   :  { %2022 = vset.pattern.permute.xlu0 %v3959_v4  ;;  %v2403_v60 = vpop.permute.xlu0 %686 }
  0xe1   :  { %1334 = vperm.xlu0 %2022, %v2155_v7  }
  0xe2   :  { %v2396_v57 = vpop.permute.xlu1 %218 }
  0xe3   :  { %4075 = vst [vmem:[#allocation22_spill] sm:$0xff] %v2396_v57  ;;  %1980 = vset.pattern.permute.xlu1 %v2076_v21 }
  0xe4   :  { %958 = vperm.xlu1 %1980, %v2168_v9  }
  0xe5   :  { %1342 = vperm.xlu0 %2022, %v2176_v11   ;;  %v2411_v51 = vpop.permute.xlu0 %174 }
  0xe6   :  { %v2401_v1 = vpop.permute.xlu1 %222 }
  0xe7   :  { %4076 = vst [vmem:[#allocation23_spill] sm:$0xff] %v2401_v1 }
  0xe8   :  { %1981 = vset.pattern.permute.xlu1 %v2088_v54 }
  0xe9   :  { %2026 = vset.pattern.permute.xlu0 %v3965_v16  ;;  %990 = vperm.xlu1 %1981, %v2168_v9   ;;  %v2422_v29 = vpop.permute.xlu0 %186 }
  0xea   :  { %1086 = vperm.xlu0 %2026, %v2168_v9  }
  0xeb   :  { %v2408_v4 = vpop.permute.xlu1 %234 }
  0xec   :  { %4077 = vst [vmem:[#allocation24_spill] sm:$0xff] %v2408_v4  ;;  %v4091_v4 = vmov 12  }
  0xed   :  { %994 = vperm.xlu1 %1981, %v2155_v7   ;;  %v2429_v36 = vpop.permute.xlu0 %714 }
  0xee   :  { %1098 = vperm.xlu0 %2026, %v2176_v11  }
  0xef   :  { %v2414_v45 = vpop.permute.xlu1 %242 }
  0xf0   :  { %4078 = vst [vmem:[#allocation25_spill] sm:$0xff] %v2414_v45 }
  0xf1   :  { %1983 = vset.pattern.permute.xlu1 %v2075_v19  ;;  %v3977_v19 = vmov 21  }
  0xf2   :  { %2030 = vset.pattern.permute.xlu0 %v3973_v18  ;;  %938 = vperm.xlu1 %1983, %v2176_v11   ;;  %v2436_v18 = vpop.permute.xlu0 %726 }
  0xf3   :  { %238 = vperm.xlu0 %2030, %v2144_v5   ;;  %v2420_v16 = vpop.permute.xlu1 %246 }
  0xf4   :  { %4079 = vst [vmem:[#allocation26_spill] sm:$0xff] %v2420_v16 }
  0xf6   :  { %1984 = vset.pattern.permute.xlu1 %v2076_v21  ;;  %v2442_v26 = vpop.permute.xlu0 %926 }
  0xf7   :  { %810 = vperm.xlu0 %2030, %v2168_v9   ;;  %966 = vperm.xlu1 %1984, %v2235_v20  }
  0xf8   :  { %v2427_v42 = vpop.permute.xlu1 %258 }
  0xf9   :  { %4080 = vst [vmem:[#allocation27_spill] sm:$0xff] %v2427_v42 }
  0xfa   :  { %v2452_v42 = vpop.permute.xlu0 %934 }
  0xfb   :  { %818 = vperm.xlu0 %2030, %v2235_v20   ;;  %1985 = vset.pattern.permute.xlu1 %v2088_v54  ;;  %v4083_v54 = vmov 27   ;;  %4087 = vst [vmem:[#allocation32_spill] sm:$0xff] %v2452_v42 }
  0xfc   :  { %998 = vperm.xlu1 %1985, %v2235_v20   ;;  %v2433_v5 = vpop.permute.xlu1 %262 }
  0xfd   :  { %4081 = vst [vmem:[#allocation28_spill] sm:$0xff] %v2433_v5 }
  0xff   :  { %2034 = vset.pattern.permute.xlu0 %v3977_v19  ;;  %v2459_v16 = vpop.permute.xlu0 %962 }
 0x100   :  { %1122 = vperm.xlu0 %2034, %v2155_v7   ;;  %1002 = vperm.xlu1 %1985, %v2176_v11  }
 0x101   :  { %v2440_v21 = vpop.permute.xlu1 %495 }
 0x102   :  { %4082 = vst [vmem:[#allocation29_spill] sm:$0xff] %v2440_v21 }
 0x104   :  { %1126 = vperm.xlu0 %2034, %v2235_v20   ;;  %1987 = vset.pattern.permute.xlu1 %v4083_v54 }
 0x105   :  { %1238 = vperm.xlu1 %1987, %v2155_v7   ;;  %v2447_v5 = vpop.permute.xlu1 %505 }
 0x106   :  { %4084 = vst [vmem:[#allocation30_spill] sm:$0xff] %v2447_v5  ;;  %v2464_v5 = vpop.permute.xlu0 %970 }
 0x109   :  { %1988 = vset.pattern.permute.xlu1 %v4085_v25  ;;  %v2450_v19 = vpop.permute.xlu1 %510 }
 0x10a   :  { %4086 = vst [vmem:[#allocation31_spill] sm:$0xff] %v2450_v19  ;;  %1266 = vperm.xlu1 %1988, %v2168_v9   ;;  %v2472_v22 = vpop.permute.xlu0 %1234 }
 0x10b   :  { %4094 = vst [vmem:[#allocation37_spill] sm:$0xff] %v2472_v22 }
 0x10e   :  { %1989 = vset.pattern.permute.xlu1 %v4088_v23  ;;  %v2456_v45 = vpop.permute.xlu1 %526  ;;  %v2479_v32 = vpop.permute.xlu0 %838 }
 0x10f   :  { %4089 = vst [vmem:[#allocation33_spill] sm:$0xff] %v2456_v45  ;;  %1022 = vperm.xlu1 %1989, %v2168_v9   ;;  %4097 = vst [vmem:[#allocation38_spill] sm:$0xff] %v2479_v32 }
 0x112   :  { %v2461_v1 = vpop.permute.xlu1 %530  ;;  %v2485_v27 = vpop.permute.xlu0 %198 }
 0x113   :  { %4090 = vst [vmem:[#allocation34_spill] sm:$0xff] %v2461_v1  ;;  %1026 = vperm.xlu1 %1989, %v2155_v7   ;;  %v4096_v1 = vmov 14  }
 0x116   :  { %v2493_v41 = vpop.permute.xlu0 %750 }
 0x117   :  { %1992 = vset.pattern.permute.xlu1 %v4091_v4  ;;  %v2467_v19 = vpop.permute.xlu1 %554  ;;  %4099 = vst [vmem:[#allocation40_spill] sm:$0xff] %v2493_v41 }
 0x118   :  { %4092 = vst [vmem:[#allocation35_spill] sm:$0xff] %v2467_v19  ;;  %842 = vperm.xlu1 %1992, %v2155_v7  }
 0x11b   :  { %v2470_v24 = vpop.permute.xlu1 %562  ;;  %v2498_v37 = vpop.permute.xlu0 %1270 }
 0x11c   :  { %4093 = vst [vmem:[#allocation36_spill] sm:$0xff] %v2470_v24  ;;  %1993 = vset.pattern.permute.xlu1 %v4095_v30  ;;  %4101 = vst [vmem:[#allocation42_spill] sm:$0xff] %v2498_v37 }
 0x11d   :  { %862 = vperm.xlu1 %1993, %v2168_v9  }
 0x11f   :  { %v2476_v57 = vpop.permute.xlu1 %566  ;;  %v2513_v14 = vpop.permute.xlu0 %1274 }
 0x120   :  { %4103 = vst [vmem:[#allocation44_spill] sm:$0xff] %v2513_v14  ;;  %v3979_v14 = vmov 0.0  }
 0x121   :  { %1994 = vset.pattern.permute.xlu1 %v4096_v1 }
 0x122   :  { %894 = vperm.xlu1 %1994, %v2168_v9  }
 0x124   :  { %v2482_v45 = vpop.permute.xlu1 %590 }
 0x126   :  { %898 = vperm.xlu1 %1994, %v2155_v7  }
 0x128   :  { %v2487_v24 = vpop.permute.xlu1 %594 }
 0x129   :  { %4098 = vst [vmem:[#allocation39_spill] sm:$0xff] %v2487_v24 }
 0x12a   :  { %1996 = vset.pattern.permute.xlu1 %v4083_v54  ;;  %v2507_v54 = vld [vmem:[%s3945_s0] sm:$0xff] }
 0x12b   :  { %1242 = vperm.xlu1 %1996, %v2235_v20   ;;  %v2511_v41 = vsub.f32 %v2507_v54, %v2411_v51  ;;  %v2525_v47 = vsub.f32 %v2507_v54, %v2343_v59  ;;  %v2536_v51 = vpop.permute.xlu0 %1034  ;;  %v1421_v22 = vsub.f32 0.0, %v2507_v54  ;;  %v2693_v44 = vsub.f32 %v2507_v54, %v2361_v2 }
 0x12c   :  { %4107 = vst [vmem:[#allocation48_spill] sm:$0xff] %v2536_v51 }
 0x12d   :  { %v2491_v31 = vpop.permute.xlu1 %618  ;;  %4102 = vst [vmem:[#allocation43_spill] sm:$0xff] %v2511_v41  ;;  %4105 = vst [vmem:[#allocation46_spill] sm:$0xff] %v2525_v47  ;;  %vm413_vm0 = vcmp.ge.f32.partialorder %v2511_v41, 0.0  ;;  %vm397_vm2 = vcmp.lt.f32.partialorder %v2511_v41, 0.0  ;;  %vm393_vm4 = vcmp.ge.f32.partialorder %v2525_v47, 0.0 }
 0x12e   :  { %vm401_vm5 = vmand %vm393_vm4, %vm397_vm2  ;;  %4136 = vst [vmem:[#allocation70_spill] sm:$0xff] %v2693_v44 }
 0x12f   :  { %1246 = vperm.xlu1 %1996, %v2176_v11   ;;  %v1744_v19 = vsel %vm401_vm5, 1.0, %v3979_v14  ;;  %v2561_v21 = vpop.permute.xlu0 %866 }
 0x130   :  { %4112 = vst [vmem:[#allocation53_spill] sm:$0xff] %v2561_v21 }
 0x131   :  { %v2496_v35 = vpop.permute.xlu1 %626 }
 0x132   :  { %4100 = vst [vmem:[#allocation41_spill] sm:$0xff] %v2496_v35 }
 0x133   :  { %1997 = vset.pattern.permute.xlu1 %v4085_v25  ;;  %v2518_v25 = vsub.f32 %v2507_v54, %v2376_v12  ;;  %v2586_v10 = vpop.permute.xlu0 %870 }
 0x134   :  { %1278 = vperm.xlu1 %1997, %v2176_v11   ;;  %4117 = vst [vmem:[#allocation58_spill] sm:$0xff] %v2586_v10  ;;  %v3982_v10 = vmov 32  }
 0x135   :  { %v2502_v42 = vpop.permute.xlu1 %630  ;;  %4104 = vst [vmem:[#allocation45_spill] sm:$0xff] %v2518_v25  ;;  %vm417_vm1 = vcmp.lt.f32.partialorder %v2518_v25, 0.0  ;;  %2037 = vset.pattern.permute.xlu0 %v3982_v10 }
 0x136   :  { %vm421_vm3 = vmand %vm413_vm0, %vm417_vm1  ;;  %1394 = vperm.xlu0 %2037, %v2168_v9  }
 0x137   :  { %v1748_v32 = vsel %vm421_vm3, 1.0, %v3979_v14 }
 0x138   :  { %1998 = vset.pattern.permute.xlu1 %v4088_v23  ;;  %v2534_v23 = vld [vmem:[%s3945_s0 + $0x18] sm:$0xff]  ;;  %v2552_v35 = vmul.f32 %v1748_v32, %v2429_v36 }
 0x139   :  { %1030 = vperm.xlu1 %1998, %v2235_v20   ;;  %4106 = vst [vmem:[#allocation47_spill] sm:$0xff] %v2534_v23  ;;  %v2543_v12 = vsub.f32 %v2534_v23, %v2422_v29  ;;  %v2632_v10 = vsub.f32 %v2534_v23, %v2320_v50 }
 0x13a   :  { %v2521_v24 = vpop.permute.xlu1 %654  ;;  %4110 = vst [vmem:[#allocation51_spill] sm:$0xff] %v2552_v35  ;;  %v2569_v32 = vmul.f32 %v2552_v35, %v2518_v25  ;;  %1406 = vperm.xlu0 %2037, %v2176_v11  }
 0x13b   :  { %vm416_vm6 = vcmp.ge.f32.partialorder %v2543_v12, 0.0  ;;  %vm400_vm8 = vcmp.lt.f32.partialorder %v2543_v12, 0.0  ;;  %4128 = vst [vmem:[#allocation67_spill] sm:$0xff] %v2632_v10  ;;  %vm356_vm15 = vcmp.ge.f32.partialorder %v2632_v10, 0.0  ;;  %vm340_vm5 = vcmp.lt.f32.partialorder %v2632_v10, 0.0 }
 0x13c   :  { %4113 = vst [vmem:[#allocation54_spill] sm:$0xff] %v2569_v32 }
 0x13d   :  { %2001 = vset.pattern.permute.xlu1 %v4091_v4  ;;  %v2548_v4 = vsub.f32 %v2534_v23, %v2388_v15 }
 0x13e   :  { %846 = vperm.xlu1 %2001, %v2235_v20   ;;  %v2539_v59 = vpop.permute.xlu1 %658 }
 0x13f   :  { %4108 = vst [vmem:[#allocation49_spill] sm:$0xff] %v2539_v59  ;;  %4109 = vst [vmem:[#allocation50_spill] sm:$0xff] %v2548_v4  ;;  %v2557_v59 = vsub.f32 %v2534_v23, %v2356_v0  ;;  %vm420_vm7 = vcmp.lt.f32.partialorder %v2548_v4, 0.0 }
 0x140   :  { %vm424_vm9 = vmand %vm416_vm6, %vm420_vm7 }
 0x141   :  { %4111 = vst [vmem:[#allocation52_spill] sm:$0xff] %v2557_v59  ;;  %vm396_vm10 = vcmp.ge.f32.partialorder %v2557_v59, 0.0  ;;  %vm380_vm3 = vcmp.lt.f32.partialorder %v2557_v59, 0.0 }
 0x142   :  { %850 = vperm.xlu1 %2001, %v2176_v11   ;;  %vm404_vm11 = vmand %vm396_vm10, %vm400_vm8 }
 0x143   :  { %v683_v29 = vpop.permute.xlu1 %682  ;;  %v1747_v62 = vsel %vm404_vm11, 1.0, %v3979_v14 }
 0x144   :  { %v2563_v15 = vmul.f32 %v1744_v19, %v683_v29  ;;  %v1751_v29 = vsel %vm424_vm9, 1.0, %v3979_v14 }
 0x145   :  { %v2584_v21 = vmul.f32 %v1751_v29, %v2436_v18  ;;  %v2601_v18 = vpop.permute.xlu0 %906  ;;  %v4119_v29 = vmov 8  }
 0x146   :  { %v2573_v36 = vmul.f32 %v2563_v15, %v2525_v47  ;;  %2002 = vset.pattern.permute.xlu1 %v4095_v30 }
 0x147   :  { %874 = vperm.xlu1 %2002, %v2176_v11   ;;  %v2577_v0 = vpop.permute.xlu1 %690  ;;  %4116 = vst [vmem:[#allocation57_spill] sm:$0xff] %v2584_v21 }
 0x148   :  { %4114 = vst [vmem:[#allocation55_spill] sm:$0xff] %v2573_v36  ;;  %4115 = vst [vmem:[#allocation56_spill] sm:$0xff] %v2577_v0  ;;  %v2595_v0 = vmul.f32 %v2584_v21, %v2548_v4  ;;  %v2617_v21 = vsub.f32 %v2534_v23, %v2367_v8  ;;  %v2636_v8 = vsub.f32 %v2534_v23, %v2286_v38  ;;  %v2663_v36 = vld [vmem:[%s3945_s0 + $0x8] sm:$0xff] }
 0x149   :  { %v2649_v38 = vsub.f32 %v2507_v54, %v2318_v49  ;;  %v2668_v49 = vsub.f32 %v2507_v54, %v2308_v46  ;;  %v2689_v35 = vsub.f32 %v2663_v36, %v2328_v53 }
 0x14a   :  { %4118 = vst [vmem:[#allocation59_spill] sm:$0xff] %v2595_v0  ;;  %4123 = vst [vmem:[#allocation63_spill] sm:$0xff] %v2617_v21  ;;  %vm360_vm12 = vcmp.lt.f32.partialorder %v2617_v21, 0.0  ;;  %vm376_vm14 = vcmp.ge.f32.partialorder %v2617_v21, 0.0  ;;  %vm316_vm1 = vcmp.ge.f32.partialorder %v2636_v8, 0.0 }
 0x14b   :  { %2003 = vset.pattern.permute.xlu1 %v4096_v1  ;;  %v695_v30 = vpop.permute.xlu1 %694  ;;  %v4124_v1 = vmov 29   ;;  %4129 = vst [vmem:[#allocation68_spill] sm:$0xff] %v2636_v8  ;;  %vm364_vm2 = vmand %vm356_vm15, %vm360_vm12  ;;  %vm333_vm8 = vcmp.ge.f32.partialorder %v2649_v38, 0.0  ;;  %vm337_vm9 = vcmp.lt.f32.partialorder %v2668_v49, 0.0  ;;  %vm357_vm15 = vcmp.lt.f32.partialorder %v2693_v44, 0.0 }
 0x14c   :  { %v2590_v56 = vmul.f32 %v1747_v62, %v695_v30  ;;  %902 = vperm.xlu1 %2003, %v2235_v20   ;;  %v2609_v62 = vpop.permute.xlu0 %1298  ;;  %vm384_vm6 = vmand %vm376_vm14, %vm380_vm3  ;;  %vm373_vm3 = vcmp.ge.f32.partialorder %v2693_v44, 0.0 }
 0x14d   :  { %4121 = vst [vmem:[#allocation61_spill] sm:$0xff] %v2609_v62  ;;  %v2625_v62 = vsub.f32 %v2534_v23, %v2325_v52  ;;  %v4130_v52 = vmov 24   ;;  %v1425_v23 = vmul.f32 1.442695, %v1421_v22  ;;  %vm2726_vm12 = vmand %vm333_vm8, %vm337_vm9  ;;  %vm374_vm9 = vcmp.ge.f32.partialorder %v2689_v35, 0.0 }
 0x14e   :  { %v2599_v19 = vmul.f32 %v2590_v56, %v2557_v59 }
 0x14f   :  { %4126 = vst [vmem:[#allocation65_spill] sm:$0xff] %v2625_v62  ;;  %vm320_vm13 = vcmp.lt.f32.partialorder %v2625_v62, 0.0  ;;  %vm336_vm0 = vcmp.ge.f32.partialorder %v2625_v62, 0.0  ;;  %2039 = vpow2.f32 %v1425_v23 }
 0x150   :  { %2005 = vset.pattern.permute.xlu1 %v4119_v29  ;;  %v2606_v14 = vpop.permute.xlu1 %718  ;;  %vm2656_vm4 = vmand %vm316_vm1, %vm320_vm13  ;;  %vm358_vm13 = vcmp.lt.f32.partialorder %v2689_v35, 0.0 }
 0x151   :  { %4120 = vst [vmem:[#allocation60_spill] sm:$0xff] %v2606_v14  ;;  %754 = vperm.xlu1 %2005, %v2235_v20   ;;  %vm344_vm7 = vmand %vm336_vm0, %vm340_vm5  ;;  %v2681_v14 = vsub.f32 %v2663_v36, %v2294_v40 }
 0x153   :  { %vm334_vm14 = vcmp.ge.f32.partialorder %v2681_v14, 0.0 }
 0x154   :  { %v2611_v30 = vpop.permute.xlu1 %722 }
 0x155   :  { %4122 = vst [vmem:[#allocation62_spill] sm:$0xff] %v2611_v30  ;;  %758 = vperm.xlu1 %2005, %v2176_v11   ;;  %v2627_v30 = vpop.permute.xlu0 %1054 }
 0x156   :  { %4127 = vst [vmem:[#allocation66_spill] sm:$0xff] %v2627_v30  ;;  %v4134_v30 = vmov 0.0  }
 0x157   :  { %v1739_v39 = vsel %vm364_vm2, 1.0, %v4134_v30  ;;  %v1743_v43 = vsel %vm384_vm6, 1.0, %v4134_v30  ;;  %v1731_v40 = vsel %vm2656_vm4, 1.0, %v4134_v30  ;;  %vm353_vm2 = vcmp.ge.f32.partialorder %v2668_v49, 0.0 }
 0x158   :  { %v636_v46 = vmul.f32 %v1739_v39, %v2502_v42  ;;  %v1735_v39 = vsel %vm344_vm7, 1.0, %v4134_v30  ;;  %v2701_v42 = vmul.f32 %v1743_v43, %v2385_v3  ;;  %v2708_v53 = vmul.f32 %v1731_v40, %v2476_v57  ;;  %vm2753_vm7 = vmand %vm353_vm2, %vm357_vm15 }
 0x159   :  { %2007 = vset.pattern.permute.xlu1 %v4124_v1  ;;  %v2620_v29 = vpop.permute.xlu1 %746  ;;  %v2653_v50 = vpop.permute.xlu0 %1150  ;;  %v604_v4 = vmul.f32 %v1735_v39, %v2340_v58  ;;  %v2717_v43 = vsub.f32 %v2663_v36, %v2364_v6 }
 0x15a   :  { %4125 = vst [vmem:[#allocation64_spill] sm:$0xff] %v2620_v29  ;;  %1302 = vperm.xlu1 %2007, %v2155_v7   ;;  %4131 = vst [vmem:[#allocation69_spill] sm:$0xff] %v2653_v50  ;;  %v2672_v50 = vsub.f32 %v2663_v36, %v2347_v61  ;;  %v1422_v61 = vsub.f32 0.0, %v2663_v36  ;;  %v672_v6 = vmul.f32 %v2701_v42, %v2557_v59 }
 0x15b   :  { %4138 = vst [vmem:[#allocation72_spill] sm:$0xff] %v2708_v53  ;;  %4140 = vst [vmem:[#allocation74_spill] sm:$0xff] %v2717_v43  ;;  %v608_v40 = vmul.f32 %v604_v4, %v2632_v10  ;;  %vm398_vm6 = vcmp.lt.f32.partialorder %v2717_v43, 0.0  ;;  %v616_v0 = vmul.f32 %v604_v4, %v2625_v62 }
 0x15c   :  { %vm354_vm10 = vcmp.ge.f32.partialorder %v2672_v50, 0.0  ;;  %vm338_vm11 = vcmp.lt.f32.partialorder %v2672_v50, 0.0  ;;  %v1427_v3 = vmul.f32 1.442695, %v1422_v61  ;;  %v584_v61 = vmul.f32 %v2708_v53, %v2636_v8 }
 0x15d   :  { %v2710_v2 = vpop.permute.xlu0 %1154  ;;  %vm2733_vm0 = vmand %vm354_vm10, %vm358_vm13  ;;  %v640_v53 = vmul.f32 %v636_v46, %v2617_v21  ;;  %vm377_vm10 = vcmp.lt.f32.partialorder %v2525_v47, 0.0 }
 0x15e   :  { %2008 = vset.pattern.permute.xlu1 %v4130_v52  ;;  %v2642_v32 = vpop.permute.xlu1 %930  ;;  %4139 = vst [vmem:[#allocation73_spill] sm:$0xff] %v2710_v2  ;;  %vm2747_vm4 = vmand %vm334_vm14, %vm338_vm11  ;;  %2041 = vpow2.f32 %v1427_v3  ;;  %v1732_v2 = vsel %vm2726_vm12, 1.0, %v4134_v30  ;;  %vm433_vm14 = vcmp.ge.f32.partialorder %v2518_v25, 0.0 }
 0x15f   :  { %1146 = vperm.xlu1 %2008, %v2168_v9   ;;  %v1733_v23 = vsel %vm2747_vm4, 1.0, %v4134_v30  ;;  %vm381_vm13 = vmand %vm373_vm3, %vm377_vm10  ;;  %vm317_vm10 = vcmp.lt.f32.partialorder %v2649_v38, 0.0 }
 0x160   :  { %v2780_v4 = vmul.f32 %v1733_v23, %v2482_v45  ;;  %v4153_v23 = vmov 9  }
 0x161   :  { %v2758_v29 = vpop.permute.xlu0 %1182 }
 0x162   :  { %4150 = vst [vmem:[#allocation76_spill] sm:$0xff] %v2758_v29  ;;  %v614_v58 = vmul.f32 %v2780_v4, %v2681_v14 }
 0x163   :  { %2009 = vset.pattern.permute.xlu1 %v4135_v48  ;;  %v2676_v37 = vpop.permute.xlu1 %958  ;;  %v2705_v48 = vsub.f32 %v2663_v36, %v2394_v17  ;;  %v648_v17 = vmul.f32 %v636_v46, %v2632_v10  ;;  %v1737_v46 = vsel %vm2733_vm0, 1.0, %v4134_v30 }
 0x164   :  { %1170 = vperm.xlu1 %2009, %v2168_v9  }
 0x165   :  { %4137 = vst [vmem:[#allocation71_spill] sm:$0xff] %v2705_v48  ;;  %vm394_vm1 = vcmp.ge.f32.partialorder %v2705_v48, 0.0  ;;  %vm378_vm5 = vcmp.lt.f32.partialorder %v2705_v48, 0.0  ;;  %v676_v10 = vsub.f32 %v648_v17, %v672_v6  ;;  %v612_v17 = vsub.f32 %v584_v61, %v608_v40 }
 0x166   :  { %vm402_vm8 = vmand %vm394_vm1, %vm398_vm6  ;;  %v644_v6 = vsub.f32 %v616_v0, %v640_v53  ;;  %v634_v40 = vmul.f32 %v1737_v46, %v2354_v63  ;;  %v215_v53 = vpop.permute.xlu0 %214  ;;  %v2803_v63 = vmul.f32 %v1732_v2, %v2332_v55  ;;  %vm414_vm6 = vcmp.ge.f32.partialorder %v2717_v43, 0.0 }
 0x167   :  { %vm382_vm11 = vmand %vm374_vm9, %vm378_vm5  ;;  %v1745_v3 = vsel %vm402_vm8, 1.0, %v4134_v30  ;;  %v2787_v22 = vmul.f32 %v2601_v18, %v612_v17  ;;  %v2790_v61 = vmul.f32 %v2464_v5, %v676_v10  ;;  %v1740_v18 = vsel %vm381_vm13, 1.0, %v4134_v30 }
 0x168   :  { %1174 = vperm.xlu1 %2009, %v2155_v7   ;;  %v2722_v57 = vpop.permute.xlu1 %990  ;;  %v1741_v45 = vsel %vm382_vm11, 1.0, %v4134_v30  ;;  %v2807_v5 = vmul.f32 %v1745_v3, %v2403_v60  ;;  %v638_v60 = vmul.f32 %v634_v40, %v2689_v35  ;;  %vm318_vm11 = vcmp.lt.f32.partialorder %v2681_v14, 0.0 }
 0x169   :  { %4141 = vst [vmem:[#allocation75_spill] sm:$0xff] %v2722_v57  ;;  %v4151_v57 = vmov 19   ;;  %4152 = vst [vmem:[#allocation77_spill] sm:$0xff] %v2787_v22  ;;  %v666_v0 = vmul.f32 %v1741_v45, %v2521_v24  ;;  %v2813_v46 = vmul.f32 %v2787_v22, %v2636_v8  ;;  %v2823_v55 = vmul.f32 %v2790_v61, %v2557_v59 }
 0x16a   :  { %v646_v59 = vmul.f32 %v634_v40, %v2672_v50  ;;  %v2854_v40 = vsub.f32 %v2507_v54, %v2277_v34 }
 0x16b   :  { %4154 = vst [vmem:[#allocation78_spill] sm:$0xff] %v2813_v46  ;;  %4156 = vst [vmem:[#allocation80_spill] sm:$0xff] %v2823_v55  ;;  %v678_v45 = vmul.f32 %v666_v0, %v2689_v35  ;;  %v704_v46 = vmul.f32 %v2590_v56, %v2543_v12 }
 0x16c   :  { %2012 = vset.pattern.permute.xlu1 %v4151_v57  ;;  %v2761_v51 = vpop.permute.xlu1 %994  ;;  %4158 = vst [vmem:[#allocation82_spill] sm:$0xff] %v2854_v40  ;;  %vm293_vm0 = vcmp.ge.f32.partialorder %v2854_v40, 0.0  ;;  %vm277_vm5 = vcmp.lt.f32.partialorder %v2854_v40, 0.0 }
 0x16d   :  { %1058 = vperm.xlu1 %2012, %v2155_v7   ;;  %v1736_v7 = vsel %vm2753_vm7, 1.0, %v4134_v30 }
 0x16e   :  { %v633_v39 = vmul.f32 %v1736_v7, %v2491_v31  ;;  %v665_v31 = vmul.f32 %v1740_v18, %v2378_v13  ;;  %v2040_v13 = vpop.eup %2039  ;;  %v2829_v7 = vsub.f32 %v2507_v54, %v215_v53 }
 0x16f   :  { %v2042_v3 = vpop.eup %2041  ;;  %v1433_v22 = vadd.f32 1.0, %v2040_v13 }
 0x170   :  { %v645_v17 = vmul.f32 %v633_v39, %v2668_v49  ;;  %4157 = vst [vmem:[#allocation81_spill] sm:$0xff] %v2829_v7  ;;  %v669_v53 = vmul.f32 %v665_v31, %v2525_v47  ;;  %vm437_vm12 = vcmp.lt.f32.partialorder %v2829_v7, 0.0 }
 0x171   :  { %2013 = vset.pattern.permute.xlu1 %v4153_v23  ;;  %v939_v29 = vpop.permute.xlu1 %938  ;;  %vm441_vm15 = vmand %vm433_vm14, %vm437_vm12  ;;  %2043 = vrcp.f32 %v1433_v22 }
 0x172   :  { %v944_v10 = vmul.f32 %v939_v29, %v644_v6  ;;  %778 = vperm.xlu1 %2013, %v2168_v9   ;;  %v637_v29 = vmul.f32 %v633_v39, %v2693_v44  ;;  %v670_v6 = vmul.f32 %v666_v0, %v2705_v48  ;;  %v613_v39 = vmul.f32 %v2803_v63, %v2649_v38 }
 0x173   :  { %v642_v0 = vsub.f32 %v614_v58, %v638_v60  ;;  %v673_v18 = vsub.f32 %v645_v17, %v669_v53  ;;  %v677_v58 = vmul.f32 %v665_v31, %v2693_v44  ;;  %v2872_v31 = vsub.f32 %v2507_v54, %v2258_v28 }
 0x174   :  { %v2816_v24 = vmul.f32 %v944_v10, %v2617_v21  ;;  %v2819_v9 = vmul.f32 %v944_v10, %v2625_v62  ;;  %v641_v8 = vsub.f32 %v613_v39, %v637_v29  ;;  %v1434_v62 = vadd.f32 1.0, %v2042_v3  ;;  %v4163_v29 = vld [vmem:[#allocation48_spill] sm:$0xff] }
 0x175   :  { %v674_v10 = vsub.f32 %v646_v59, %v670_v6  ;;  %v2859_v13 = vmul.f32 %v2642_v32, %v642_v0  ;;  %v973_v56 = vmul.f32 %v2676_v37, %v673_v18  ;;  %4159 = vst [vmem:[#allocation83_spill] sm:$0xff] %v2872_v31  ;;  %v2876_v32 = vsub.f32 %v2507_v54, %v2274_v33 }
 0x176   :  { %4155 = vst [vmem:[#allocation79_spill] sm:$0xff] %v2816_v24  ;;  %2014 = vset.pattern.permute.xlu1 %v4124_v1  ;;  %v2834_v2 = vpop.permute.xlu1 %966  ;;  %v702_v1 = vmul.f32 %v2807_v5, %v2717_v43  ;;  %v701_v24 = vmul.f32 %v2563_v15, %v2511_v41  ;;  %v680_v15 = vmul.f32 %v2701_v42, %v2617_v21  ;;  %2045 = vrcp.f32 %v1434_v62 }
 0x177   :  { %1306 = vperm.xlu1 %2014, %v2235_v20   ;;  %4160 = vst [vmem:[#allocation84_spill] sm:$0xff] %v2876_v32  ;;  %v2880_v60 = vsub.f32 %v2663_v36, %v2485_v27  ;;  %v2883_v42 = vmul.f32 %v2442_v26, %v641_v8  ;;  %v974_v37 = vmul.f32 %v2459_v16, %v674_v10  ;;  %v1752_v28 = vsel %vm441_vm15, 1.0, %v4134_v30  ;;  %v4161_v27 = vld [vmem:[#allocation59_spill] sm:$0xff]  ;;  %v4171_v10 = vld [vmem:[#allocation50_spill] sm:$0xff] }
 0x178   :  { %v706_v55 = vsub.f32 %v678_v45, %v702_v1  ;;  %v708_v22 = vsub.f32 %v680_v15, %v704_v46  ;;  %v954_v33 = vmul.f32 %v2859_v13, %v2681_v14  ;;  %v4162_v62 = vsub.f32 %v2599_v19, %v4161_v27  ;;  %v4165_v8 = vld [vmem:[#allocation75_spill] sm:$0xff]  ;;  %v4166_v19 = vld [vmem:[#allocation64_spill] sm:$0xff] }
 0x179   :  { %v977_v16 = vmul.f32 %v973_v56, %v2525_v47  ;;  %vm297_vm1 = vcmp.lt.f32.partialorder %v2876_v32, 0.0  ;;  %vm418_vm2 = vcmp.lt.f32.partialorder %v2880_v60, 0.0  ;;  %v953_v3 = vmul.f32 %v2883_v42, %v2649_v38  ;;  %v2947_v27 = vld [vmem:[%s3945_s0 + $0x10] sm:$0xff] }
 0x17a   :  { %v2868_v34 = vmul.f32 %v2761_v51, %v706_v55  ;;  %v705_v51 = vsub.f32 %v677_v58, %v701_v24  ;;  %v2895_v26 = vmul.f32 %v4163_v29, %v4162_v62  ;;  %v986_v6 = vmul.f32 %v974_v37, %v2672_v50  ;;  %vm2921_vm3 = vmand %vm293_vm0, %vm297_vm1 }
 0x17b   :  { %1310 = vperm.xlu1 %2014, %v2176_v11   ;;  %v2862_v59 = vpop.permute.xlu1 %998  ;;  %v978_v18 = vmul.f32 %v974_v37, %v2705_v48  ;;  %vm273_vm4 = vcmp.ge.f32.partialorder %v2872_v31, 0.0  ;;  %vm2932_vm7 = vmand %vm414_vm6, %vm418_vm2  ;;  %v981_v1 = vsub.f32 %v953_v3, %v977_v16  ;;  %v4175_v15 = vmov 25  }
 0x17c   :  { %4164 = vst [vmem:[#allocation59_spill] sm:$0xff] %v2895_v26  ;;  %v2899_v46 = vmul.f32 %v4165_v8, %v705_v51  ;;  %v1010_v24 = vmul.f32 %v2868_v34, %v2717_v43  ;;  %v2930_v39 = vmul.f32 %v2895_v26, %v4171_v10  ;;  %v1724_v62 = vsel %vm2921_vm3, 1.0, %v4134_v30  ;;  %vm281_vm8 = vmand %vm273_vm4, %vm277_vm5  ;;  %v4177_v8 = vld [vmem:[#allocation14_spill] sm:$0xff]  ;;  %v4187_v26 = vld [vmem:[#allocation17_spill] sm:$0xff] }
 0x17d   :  { %v982_v51 = vsub.f32 %v954_v33, %v978_v18  ;;  %vm313_vm9 = vcmp.ge.f32.partialorder %v2876_v32, 0.0  ;;  %v985_v33 = vmul.f32 %v973_v56, %v2668_v49 }
 0x17e   :  { %4172 = vst [vmem:[#allocation64_spill] sm:$0xff] %v2930_v39  ;;  %v1009_v0 = vmul.f32 %v2899_v46, %v2511_v41  ;;  %v1014_v58 = vsub.f32 %v986_v6, %v1010_v24  ;;  %v2962_v24 = vsub.f32 %v2947_v27, %v4177_v8  ;;  %v4180_v6 = vld [vmem:[#allocation51_spill] sm:$0xff]  ;;  %v4185_v8 = vld [vmem:[#allocation42_spill] sm:$0xff]  ;;  %vm3004_vm14 = vmand %vm313_vm9, %vm317_vm10 }
 0x17f   :  { %2015 = vset.pattern.permute.xlu1 %v4130_v52  ;;  %v1003_v55 = vpop.permute.xlu1 %1002  ;;  %v2909_v52 = vmul.f32 %v1752_v28, %v4166_v19  ;;  %v4178_v19 = vld [vmem:[#allocation15_spill] sm:$0xff]  ;;  %v741_v18 = vmul.f32 %v4180_v6, %v2511_v41  ;;  %v1720_v6 = vsel %vm281_vm8, 1.0, %v4134_v30  ;;  %v4197_v39 = vld [vmem:[#allocation20_spill] sm:$0xff] }
 0x180   :  { %v2903_v17 = vmul.f32 %v1003_v55, %v708_v22  ;;  %1158 = vperm.xlu1 %2015, %v2176_v11   ;;  %v2044_v55 = vpop.eup %2043  ;;  %v2966_v3 = vsub.f32 %v2663_v36, %v4178_v19  ;;  %v1749_v11 = vsel %vm2932_vm7, 1.0, %v4134_v30  ;;  %v2984_v19 = vsub.f32 %v2947_v27, %v4187_v26 }
 0x181   :  { %4167 = vst [vmem:[#allocation48_spill] sm:$0xff] %v2909_v52  ;;  %v765_v22 = vmul.f32 %v2909_v52, %v2829_v7  ;;  %v2046_v16 = vpop.eup %2045  ;;  %vm335_vm12 = vcmp.ge.f32.partialorder %v2962_v24, 0.0  ;;  %v1445_v26 = vmul.f32 %v2044_v55, %v2507_v54  ;;  %v4191_v55 = vld [vmem:[#allocation18_spill] sm:$0xff] }
 0x182   :  { %v2916_v45 = vmul.f32 %v2903_v17, %v2617_v21  ;;  %4179 = vst [vmem:[#allocation14_spill] sm:$0xff] %v2966_v3  ;;  %v2980_v21 = vmul.f32 %v4185_v8, %v1014_v58  ;;  %vm314_vm13 = vcmp.ge.f32.partialorder %v2966_v3, 0.0  ;;  %vm339_vm15 = vcmp.lt.f32.partialorder %v2984_v19, 0.0 }
 0x183   :  { %v769_v53 = vsub.f32 %v741_v18, %v765_v22  ;;  %v4193_v18 = vld [vmem:[#allocation19_spill] sm:$0xff]  ;;  %vm3067_vm2 = vmand %vm314_vm13, %vm318_vm11  ;;  %vm355_vm4 = vcmp.ge.f32.partialorder %v2984_v19, 0.0 }
 0x184   :  { %4168 = vst [vmem:[#allocation75_spill] sm:$0xff] %v2916_v45  ;;  %2016 = vset.pattern.permute.xlu1 %v4175_v15  ;;  %v1239_v37 = vpop.permute.xlu1 %1238  ;;  %v4181_v15 = vld [vmem:[#allocation60_spill] sm:$0xff]  ;;  %v1286_v54 = vmul.f32 %v2980_v21, %v2717_v43  ;;  %v3039_v45 = vsub.f32 %v2947_v27, %v4197_v39  ;;  %v4202_v43 = vld [vmem:[#allocation29_spill] sm:$0xff]  ;;  %vm3080_vm3 = vmand %vm335_vm12, %vm339_vm15 }
 0x185   :  { %1178 = vperm.xlu1 %2016, %v2235_v20   ;;  %v2958_v29 = vmul.f32 %v1239_v37, %v982_v51  ;;  %v2974_v56 = vmul.f32 %v1749_v11, %v4181_v15  ;;  %v1013_v37 = vsub.f32 %v985_v33, %v1009_v0  ;;  %v4183_v51 = vld [vmem:[#allocation37_spill] sm:$0xff]  ;;  %4186 = vst [vmem:[#allocation60_spill] sm:$0xff] %v2980_v21  ;;  %v4188_v15 = vld [vmem:[#allocation12_spill] sm:$0xff] }
 0x186   :  { %v2977_v28 = vmul.f32 %v4183_v51, %v981_v1  ;;  %v2990_v0 = vmul.f32 %v1724_v62, %v4188_v15  ;;  %v4195_v51 = vld [vmem:[#allocation66_spill] sm:$0xff]  ;;  %v3033_v15 = vld [vmem:[%s3944_s2 + $0x18] sm:$0xff]  ;;  %v513_v21 = vmul.f32 %v1720_v6, %v4202_v43  ;;  %vm399_vm6 = vcmp.lt.f32.partialorder %v3039_v45, 0.0 }
 0x187   :  { %4176 = vst [vmem:[#allocation85_spill] sm:$0xff] %v2958_v29  ;;  %4182 = vst [vmem:[#allocation15_spill] sm:$0xff] %v2974_v56  ;;  %v1262_v1 = vmul.f32 %v2958_v29, %v2681_v14  ;;  %v734_v62 = vmul.f32 %v2974_v56, %v2880_v60  ;;  %v3026_v8 = vmul.f32 %v4195_v51, %v769_v53  ;;  %v4198_v53 = vld [vmem:[#allocation55_spill] sm:$0xff]  ;;  %v4199_v51 = vld [vmem:[#allocation54_spill] sm:$0xff]  ;;  %vm415_vm13 = vcmp.ge.f32.partialorder %v3039_v45, 0.0 }
 0x188   :  { %4184 = vst [vmem:[#allocation51_spill] sm:$0xff] %v2977_v28  ;;  %v1261_v33 = vmul.f32 %v2977_v28, %v2649_v38 }
 0x189   :  { %2019 = vset.pattern.permute.xlu1 %v4151_v57  ;;  %v1267_v11 = vpop.permute.xlu1 %1266  ;;  %v1446_v57 = vmul.f32 %v2046_v16, %v2663_v36  ;;  %v3018_v16 = vsub.f32 %v2947_v27, %v4191_v55  ;;  %4196 = vst [vmem:[#allocation17_spill] sm:$0xff] %v3026_v8  ;;  %v1290_v28 = vsub.f32 %v1262_v1, %v1286_v54 }
 0x18a   :  { %v2995_v58 = vmul.f32 %v1267_v11, %v1013_v37  ;;  %1062 = vperm.xlu1 %2019, %v2235_v20   ;;  %v3022_v37 = vsub.f32 %v2947_v27, %v4193_v18  ;;  %v710_v11 = vmul.f32 %v2807_v5, %v2705_v48  ;;  %v1423_v18 = vsub.f32 0.0, %v2947_v27  ;;  %v4201_v48 = vld [vmem:[#allocation47_spill] sm:$0xff] }
 0x18b   :  { %4192 = vst [vmem:[#allocation37_spill] sm:$0xff] %v3018_v16  ;;  %v1728_v5 = vsel %vm3004_vm14, 1.0, %v4134_v30  ;;  %v1424_v56 = vsub.f32 0.0, %v4201_v48  ;;  %v1017_v54 = vmul.f32 %v2899_v46, %v2693_v44  ;;  %v3057_v22 = vmul.f32 %v3026_v8, %v2829_v7 }
 0x18c   :  { %v1285_v20 = vmul.f32 %v2995_v58, %v2511_v41  ;;  %4194 = vst [vmem:[#allocation42_spill] sm:$0xff] %v3022_v37  ;;  %v4200_v41 = vsub.f32 %v4198_v53, %v4199_v51  ;;  %vm359_vm0 = vcmp.lt.f32.partialorder %v3018_v16, 0.0  ;;  %vm379_vm1 = vcmp.lt.f32.partialorder %v3022_v37, 0.0 }
 0x18d   :  { %4204 = vst [vmem:[#allocation18_spill] sm:$0xff] %v3057_v22  ;;  %v1429_v46 = vmul.f32 1.442695, %v1423_v18  ;;  %v1431_v6 = vmul.f32 1.442695, %v1424_v56  ;;  %vm375_vm5 = vcmp.ge.f32.partialorder %v3018_v16, 0.0  ;;  %v517_v56 = vmul.f32 %v513_v21, %v2872_v31  ;;  %vm3090_vm7 = vmand %vm355_vm4, %vm359_vm0 }
 0x18e   :  { %1066 = vperm.xlu1 %2019, %v3033_v15   ;;  %v1023_v55 = vpop.permute.xlu1 %1022  ;;  %v1289_v29 = vsub.f32 %v1261_v33, %v1285_v20  ;;  %v738_v20 = vsub.f32 %v710_v11, %v734_v62  ;;  %v1862_v33 = vpack.c.bf16 %v1446_v57, %v1445_v26  ;;  %v3096_v62 = vmul.f32 %v2868_v34, %v2689_v35  ;;  %v4213_v11 = vld [vmem:[#allocation61_spill] sm:$0xff]  ;;  %vm3110_vm8 = vmand %vm375_vm5, %vm379_vm1  ;;  %v4225_v26 = vld [vmem:[#allocation16_spill] sm:$0xff] }
 0x18f   :  { %v1037_v52 = vmul.f32 %v1023_v55, %v4200_v41  ;;  %v4205_v41 = vld [vmem:[#allocation35_spill] sm:$0xff]  ;;  %v541_v21 = vmul.f32 %v2990_v0, %v2876_v32  ;;  %vm395_vm9 = vcmp.ge.f32.partialorder %v3022_v37, 0.0  ;;  %2047 = vpow2.f32 %v1429_v46 }
 0x190   :  { %v1860_v1 = vpack.c.bf16 %v1290_v28, %v1289_v29  ;;  %v569_v55 = vmul.f32 %v1728_v5, %v4205_v41  ;;  %vm3115_vm10 = vmand %vm395_vm9, %vm399_vm6  ;;  %2049 = vpow2.f32 %v1431_v6  ;;  %v549_v41 = vmul.f32 %v2990_v0, %v2854_v40 }
 0x191   :  { %v1041_v39 = vmul.f32 %v1037_v52, %v2518_v25  ;;  %v3053_v10 = vmul.f32 %v1037_v52, %v2525_v47  ;;  %v545_v46 = vsub.f32 %v517_v56, %v541_v21  ;;  %v1734_v0 = vsel %vm3080_vm3, 1.0, %v4134_v30  ;;  %v4221_v52 = vld [vmem:[#allocation41_spill] sm:$0xff]  ;;  %v4222_v21 = vld [vmem:[#allocation38_spill] sm:$0xff] }
 0x192   :  { %2020 = vset.pattern.permute.xlu1 %v4153_v23  ;;  %v1027_v43 = vpop.permute.xlu1 %1026  ;;  %1861 = vmatprep.subr.bf16.mxu0 %v1860_v1  ;;  %v573_v53 = vmul.f32 %v569_v55, %v2649_v38  ;;  %v1742_v23 = vsel %vm3110_vm8, 1.0, %v4134_v30  ;;  %v1746_v56 = vsel %vm3115_vm10, 1.0, %v4134_v30  ;;  %v4028_v8 = vmov 26  }
 0x193   :  { %4203 = vst [vmem:[#allocation12_spill] sm:$0xff] %v3053_v10  ;;  %v1045_v28 = vsub.f32 %v1017_v54, %v1041_v39  ;;  %v3071_v29 = vmul.f32 %v1027_v43, %v738_v20  ;;  %1900 = vmatprep.subr.bf16.mxu1 %v1860_v1  ;;  %790 = vperm.xlu1 %2020, %v3033_v15   ;;  %v4219_v1 = vmov 30   ;;  %v3140_v43 = vld [vmem:[%s3944_s2] sm:$0xff]  ;;  %v4223_v54 = vld [vmem:[#allocation49_spill] sm:$0xff]  ;;  %vm319_vm1 = vcmp.lt.f32.partialorder %v2962_v24, 0.0 }
 0x194   :  { %1863 = vmatpush3.bf16.msra.mxu0 %v1862_v33  ;;  %1908 = vmatpush3.bf16.msra.mxu1 %v1862_v33  ;;  %v3121_v20 = vmul.f32 %v2995_v58, %v2668_v49  ;;  %v1729_v58 = vsel %vm3067_vm2, 1.0, %v4134_v30  ;;  %v853_v57 = vmul.f32 %v4222_v21, %v545_v46  ;;  %v667_v47 = vmul.f32 %v1742_v23, %v4223_v54 }
 0x195   :  { %4208 = vst [vmem:[#allocation19_spill] sm:$0xff] %v3071_v29  ;;  %v3099_v18 = vmul.f32 %v4213_v11, %v1045_v28  ;;  %v3103_v5 = vmul.f32 %v3071_v29, %v2880_v60  ;;  %v1738_v28 = vsel %vm3090_vm7, 1.0, %v4134_v30  ;;  %v577_v22 = vsub.f32 %v549_v41, %v573_v53 }
 0x196   :  { %v635_v11 = vmul.f32 %v1738_v28, %v4221_v52  ;;  %v3164_v10 = vmul.f32 %v1729_v58, %v4225_v26  ;;  %v581_v28 = vmul.f32 %v569_v55, %v2876_v32  ;;  %v4226_v52 = vld [vmem:[#allocation39_spill] sm:$0xff]  ;;  %v605_v23 = vmul.f32 %v2803_v63, %v2668_v49 }
 0x197   :  { %4214 = vst [vmem:[#allocation66_spill] sm:$0xff] %v3099_v18  ;;  %2021 = vset.pattern.permute.xlu1 %v4219_v1  ;;  %v3124_v33 = vpop.permute.xlu1 %842  ;;  %v3130_v39 = vmul.f32 %v3099_v18, %v2518_v25  ;;  %v4224_v18 = vld [vmem:[#allocation56_spill] sm:$0xff]  ;;  %v3168_v51 = vmul.f32 %v1734_v0, %v4226_v52  ;;  %v3178_v55 = vmul.f32 %v853_v57, %v2872_v31  ;;  %v3195_v57 = vld [vmem:[%s3944_s2 + $0x8] sm:$0xff]  ;;  %v4227_v52 = vld [vmem:[#allocation21_spill] sm:$0xff]  ;;  %vm298_vm5 = vcmp.lt.f32.partialorder %v2966_v3, 0.0 }
 0x198   :  { %1330 = vperm.xlu1 %2021, %v3140_v43   ;;  %v3161_v6 = vmul.f32 %v1746_v56, %v4224_v18  ;;  %v606_v18 = vmul.f32 %v2780_v4, %v2672_v50  ;;  %v639_v53 = vmul.f32 %v635_v11, %v3018_v16  ;;  %v671_v54 = vmul.f32 %v667_v47, %v3022_v37 }
 0x199   :  { %4220 = vst [vmem:[#allocation20_spill] sm:$0xff] %v3130_v39  ;;  %v2048_v58 = vpop.eup %2047  ;;  %v582_v63 = vmul.f32 %v3164_v10, %v2966_v3  ;;  %v615_v4 = vmul.f32 %v3168_v51, %v2962_v24  ;;  %v609_v46 = vsub.f32 %v581_v28, %v605_v23  ;;  %v647_v56 = vmul.f32 %v635_v11, %v2984_v19 }
 0x19a   :  { %v703_v41 = vmul.f32 %v3161_v6, %v3039_v45  ;;  %v2050_v0 = vpop.eup %2049  ;;  %v679_v21 = vmul.f32 %v667_v47, %v3018_v16  ;;  %v1435_v29 = vadd.f32 1.0, %v2048_v58  ;;  %v3206_v7 = vmul.f32 %v2883_v42, %v2693_v44 }
 0x19b   :  { %v643_v28 = vsub.f32 %v615_v4, %v639_v53  ;;  %v610_v11 = vsub.f32 %v582_v63, %v606_v18  ;;  %v4230_v18 = vmov 20  }
 0x19c   :  { %2023 = vset.pattern.permute.xlu1 %v4028_v8  ;;  %v863_v34 = vpop.permute.xlu1 %862  ;;  %v675_v8 = vsub.f32 %v647_v56, %v671_v54  ;;  %v707_v47 = vsub.f32 %v679_v21, %v703_v41  ;;  %4228 = vst [vmem:[#allocation55_spill] sm:$0xff] %v3206_v7  ;;  %2051 = vrcp.f32 %v1435_v29  ;;  %v227_v7 = vpop.permute.xlu0 %226 }
 0x19d   :  { %v877_v25 = vmul.f32 %v863_v34, %v577_v22  ;;  %1202 = vperm.xlu1 %2023, %v3140_v43   ;;  %v3202_v34 = vsub.f32 %v2947_v27, %v4227_v52  ;;  %v1436_v52 = vadd.f32 1.0, %v2050_v0  ;;  %v3248_v0 = vld [vmem:[%s3944_s2 + $0x10] sm:$0xff] }
 0x19e   :  { %v975_v53 = vmul.f32 %v2834_v2, %v675_v8  ;;  %v1007_v41 = vmul.f32 %v2862_v59, %v707_v47  ;;  %v3230_v2 = vmul.f32 %v2859_v13, %v2689_v35  ;;  %v4233_v8 = vld [vmem:[#allocation32_spill] sm:$0xff]  ;;  %v4234_v47 = vld [vmem:[#allocation62_spill] sm:$0xff] }
 0x19f   :  { %v3184_v22 = vmul.f32 %v877_v25, %v2649_v38  ;;  %v3209_v31 = vmul.f32 %v877_v25, %v2854_v40  ;;  %vm419_vm11 = vcmp.lt.f32.partialorder %v3202_v34, 0.0  ;;  %v3237_v63 = vmul.f32 %v4233_v8, %v643_v28 }
 0x1a0   :  { %4231 = vst [vmem:[#allocation47_spill] sm:$0xff] %v3230_v2  ;;  %2053 = vrcp.f32 %v1436_v52  ;;  %v979_v4 = vmul.f32 %v975_v53, %v3022_v37  ;;  %vm423_vm12 = vmand %vm415_vm13, %vm419_vm11  ;;  %v987_v56 = vmul.f32 %v975_v53, %v2984_v19  ;;  %v1012_v28 = vmul.f32 %v2903_v17, %v2543_v12  ;;  %v4237_v53 = vld [vmem:[#allocation67_spill] sm:$0xff]  ;;  %v4239_v17 = vld [vmem:[#allocation80_spill] sm:$0xff] }
 0x1a1   :  { %1206 = vperm.xlu1 %2023, %v3195_v57   ;;  %v895_v38 = vpop.permute.xlu1 %894  ;;  %v955_v21 = vmul.f32 %v3237_v63, %v2962_v24  ;;  %v988_v13 = vmul.f32 %v2790_v61, %v4237_v53 }
 0x1a2   :  { %v909_v23 = vmul.f32 %v895_v38, %v609_v46  ;;  %v1011_v46 = vmul.f32 %v1007_v41, %v3039_v45  ;;  %v1750_v38 = vsel %vm423_vm12, 1.0, %v4134_v30  ;;  %vm434_vm12 = vcmp.ge.f32.partialorder %v2880_v60, 0.0 }
 0x1a3   :  { %v3258_v52 = vmul.f32 %v1750_v38, %v4234_v47  ;;  %v1016_v38 = vsub.f32 %v988_v13, %v1012_v28  ;;  %v4242_v47 = vld [vmem:[#allocation11_spill] sm:$0xff] }
 0x1a4   :  { %v3212_v39 = vmul.f32 %v909_v23, %v2668_v49  ;;  %v3215_v26 = vmul.f32 %v909_v23, %v2876_v32  ;;  %v983_v23 = vsub.f32 %v955_v21, %v979_v4  ;;  %v4240_v4 = vsub.f32 %v2819_v9, %v4239_v17 }
 0x1a5   :  { %2024 = vset.pattern.permute.xlu1 %v4230_v18  ;;  %v899_v54 = vpop.permute.xlu1 %898  ;;  %v711_v9 = vmul.f32 %v3161_v6, %v3022_v37 }
 0x1a6   :  { %4229 = vst [vmem:[#allocation54_spill] sm:$0xff] %v3215_v26  ;;  %v3220_v58 = vmul.f32 %v899_v54, %v610_v11  ;;  %1090 = vperm.xlu1 %2024, %v3195_v57   ;;  %v4235_v54 = vmov 26   ;;  %v2052_v42 = vpop.eup %2051 }
 0x1a7   :  { %v1447_v13 = vmul.f32 %v2052_v42, %v2947_v27 }
 0x1a8   :  { %v3234_v59 = vmul.f32 %v3220_v58, %v2966_v3 }
 0x1aa   :  { %4232 = vst [vmem:[#allocation29_spill] sm:$0xff] %v3234_v59  ;;  %2025 = vset.pattern.permute.xlu1 %v4219_v1  ;;  %v1243_v29 = vpop.permute.xlu1 %1242  ;;  %v1015_v1 = vsub.f32 %v987_v56, %v1011_v46  ;;  %v2054_v25 = vpop.eup %2053  ;;  %v4238_v46 = vld [vmem:[#allocation44_spill] sm:$0xff] }
 0x1ab   :  { %1338 = vperm.xlu1 %2025, %v3248_v0   ;;  %v3261_v8 = vmul.f32 %v1243_v29, %v983_v23  ;;  %v735_v29 = vmul.f32 %v3258_v52, %v3202_v34 }
 0x1ac   :  { %v3267_v56 = vmul.f32 %v4238_v46, %v1015_v1  ;;  %v1448_v1 = vmul.f32 %v2054_v25, %v4201_v48 }
 0x1ad   :  { %4236 = vst [vmem:[#allocation35_spill] sm:$0xff] %v3261_v8  ;;  %v1263_v61 = vmul.f32 %v3261_v8, %v2962_v24 }
 0x1ae   :  { %v1247_v11 = vpop.permute.xlu1 %1246  ;;  %v1287_v28 = vmul.f32 %v3267_v56, %v3039_v45  ;;  %v1866_v8 = vpack.c.bf16 %v1448_v1, %v1447_v13 }
 0x1af   :  { %2027 = vset.pattern.permute.xlu1 %v4235_v54  ;;  %v3272_v21 = vmul.f32 %v1247_v11, %v4240_v4  ;;  %v3278_v54 = vsub.f32 %v4201_v48, %v4242_v47  ;;  %v4243_v11 = vld [vmem:[#allocation65_spill] sm:$0xff]  ;;  %v739_v4 = vsub.f32 %v711_v9, %v735_v29  ;;  %v4245_v47 = vmov 10  }
 0x1b0   :  { %1210 = vperm.xlu1 %2027, %v3248_v0   ;;  %v3306_v29 = vmul.f32 %v1007_v41, %v3018_v16  ;;  %v4248_v41 = vld [vmem:[#allocation13_spill] sm:$0xff] }
 0x1b1   :  { %4241 = vst [vmem:[#allocation61_spill] sm:$0xff] %v3272_v21  ;;  %v1264_v46 = vmul.f32 %v3272_v21, %v4243_v11  ;;  %vm296_vm14 = vcmp.ge.f32.partialorder %v3278_v54, 0.0  ;;  %v4247_v21 = vld [vmem:[#allocation10_spill] sm:$0xff] }
 0x1b2   :  { %v3303_v32 = vsub.f32 %v2947_v27, %v4247_v21  ;;  %v607_v21 = vmul.f32 %v3168_v51, %v2984_v19 }
 0x1b3   :  { %v1279_v23 = vpop.permute.xlu1 %1278 }
 0x1b4   :  { %v3282_v2 = vmul.f32 %v1279_v23, %v1016_v38  ;;  %1214 = vperm.xlu1 %2027, %v3033_v15   ;;  %v4244_v38 = vld [vmem:[#allocation68_spill] sm:$0xff]  ;;  %v1291_v23 = vsub.f32 %v1263_v61, %v1287_v28  ;;  %vm315_vm2 = vcmp.ge.f32.partialorder %v3303_v32, 0.0 }
 0x1b5   :  { %vm300_vm15 = vcmp.lt.f32.partialorder %v4244_v38, 0.0  ;;  %vm323_vm3 = vmand %vm315_vm2, %vm319_vm1  ;;  %vm280_vm1 = vcmp.lt.f32.partialorder %v3278_v54, 0.0 }
 0x1b6   :  { %v1288_v17 = vmul.f32 %v3282_v2, %v2543_v12  ;;  %vm304_vm0 = vmand %vm296_vm14, %vm300_vm15 }
 0x1b7   :  { %v1727_v13 = vsel %vm304_vm0, 1.0, %v4134_v30  ;;  %vm299_vm0 = vcmp.lt.f32.partialorder %v3303_v32, 0.0 }
 0x1b8   :  { %v1292_v6 = vsub.f32 %v1264_v46, %v1288_v17  ;;  %2028 = vset.pattern.permute.xlu1 %v4245_v47  ;;  %v1031_v42 = vpop.permute.xlu1 %1030  ;;  %v3321_v1 = vmul.f32 %v1727_v13, %v4248_v41  ;;  %v2094_v46 = vmov 31   ;;  %v4252_v41 = vld [vmem:[#allocation6_spill] sm:$0xff] }
 0x1b9   :  { %v3298_v25 = vmul.f32 %v1031_v42, %v739_v4  ;;  %814 = vperm.xlu1 %2028, %v3195_v57   ;;  %v1730_v4 = vsel %vm323_vm3, 1.0, %v4134_v30 }
 0x1ba   :  { %v1864_v59 = vpack.c.bf16 %v1292_v6, %v1291_v23  ;;  %v552_v17 = vmul.f32 %v3321_v1, %v3278_v54  ;;  %v4251_v6 = vld [vmem:[#allocation36_spill] sm:$0xff] }
 0x1bb   :  { %4246 = vst [vmem:[#allocation41_spill] sm:$0xff] %v3298_v25  ;;  %v3310_v61 = vmul.f32 %v3298_v25, %v3202_v34  ;;  %v3337_v42 = vmul.f32 %v1730_v4, %v4251_v6 }
 0x1bc   :  { %1865 = vmatprep.subr.bf16.mxu0 %v1864_v59  ;;  %1901 = vmatprep.subr.bf16.mxu1 %v1864_v59  ;;  %v4249_v59 = vld [vmem:[#allocation72_spill] sm:$0xff] }
 0x1bd   :  { %2029 = vset.pattern.permute.xlu1 %v4230_v18  ;;  %v3314_v9 = vpop.permute.xlu1 %846  ;;  %1867 = vmatpush3.bf16.msra.mxu0 %v1866_v8  ;;  %v576_v18 = vmul.f32 %v4249_v59, %v4243_v11  ;;  %v3341_v59 = vsub.f32 %v2663_v36, %v4252_v41  ;;  %v583_v4 = vmul.f32 %v3337_v42, %v3303_v32 }
 0x1be   :  { %1094 = vperm.xlu1 %2029, %v3248_v0   ;;  %1909 = vmatpush3.bf16.msra.mxu1 %v1866_v8  ;;  %v4250_v8 = vld [vmem:[#allocation8_spill] sm:$0xff] }
 0x1bf   :  { %v3334_v23 = vsub.f32 %v2663_v36, %v4250_v8  ;;  %v580_v13 = vsub.f32 %v552_v17, %v576_v18  ;;  %v4253_v18 = vld [vmem:[#allocation77_spill] sm:$0xff]  ;;  %vm278_vm6 = vcmp.lt.f32.partialorder %v3341_v59, 0.0  ;;  %v611_v51 = vsub.f32 %v583_v4, %v607_v21 }
 0x1c0   :  { %v916_v17 = vmul.f32 %v4253_v18, %v4237_v53  ;;  %vm294_vm8 = vcmp.ge.f32.partialorder %v3341_v59, 0.0  ;;  %v4254_v18 = vld [vmem:[#allocation76_spill] sm:$0xff] }
 0x1c1   :  { %v3326_v28 = vpop.permute.xlu1 %850  ;;  %vm274_vm4 = vcmp.ge.f32.partialorder %v3334_v23, 0.0  ;;  %vm302_vm9 = vmand %vm294_vm8, %vm298_vm5 }
 0x1c2   :  { %2031 = vset.pattern.permute.xlu1 %v2094_v46  ;;  %vm282_vm7 = vmand %vm274_vm4, %vm278_vm6  ;;  %v1725_v21 = vsel %vm302_vm9, 1.0, %v4134_v30 }
 0x1c3   :  { %1362 = vperm.xlu1 %2031, %v3140_v43  }
 0x1c6   :  { %v875_v40 = vpop.permute.xlu1 %874 }
 0x1c7   :  { %v3345_v26 = vmul.f32 %v875_v40, %v580_v13  ;;  %1366 = vperm.xlu1 %2031, %v3195_v57   ;;  %v3358_v40 = vsub.f32 %v4201_v48, %v227_v7  ;;  %v3375_v7 = vmul.f32 %v3237_v63, %v3018_v16  ;;  %v4263_v63 = vld [vmem:[#allocation57_spill] sm:$0xff] }
 0x1c9   :  { %v892_v8 = vmul.f32 %v3345_v26, %v3278_v54  ;;  %vm440_vm10 = vcmp.lt.f32.partialorder %v3358_v40, 0.0  ;;  %4257 = vst [vmem:[#allocation56_spill] sm:$0xff] %v3375_v7 }
 0x1cb   :  { %v920_v6 = vsub.f32 %v892_v8, %v916_v17  ;;  %2032 = vset.pattern.permute.xlu1 %v4245_v47  ;;  %v903_v13 = vpop.permute.xlu1 %902  ;;  %v1721_v47 = vsel %vm282_vm7, 1.0, %v4134_v30  ;;  %v4259_v17 = vld [vmem:[#allocation33_spill] sm:$0xff] }
 0x1cc   :  { %v3362_v41 = vmul.f32 %v903_v13, %v611_v51  ;;  %822 = vperm.xlu1 %2032, %v3033_v15   ;;  %v538_v8 = vmul.f32 %v1725_v21, %v4259_v17  ;;  %v4260_v51 = vmov 21   ;;  %v4261_v13 = vld [vmem:[#allocation50_spill] sm:$0xff] }
 0x1cd   :  { %v3366_v44 = vmul.f32 %v4254_v18, %v920_v6  ;;  %vm436_vm11 = vcmp.ge.f32.partialorder %v4261_v13, 0.0  ;;  %v4262_v18 = vld [vmem:[#allocation9_spill] sm:$0xff] }
 0x1ce   :  { %v3370_v48 = vmul.f32 %v3362_v41, %v3303_v32  ;;  %vm444_vm13 = vmand %vm436_vm11, %vm440_vm10  ;;  %v514_v16 = vmul.f32 %v1721_v47, %v4262_v18  ;;  %v542_v25 = vmul.f32 %v538_v8, %v2966_v3  ;;  %v574_v18 = vmul.f32 %v3164_v10, %v2681_v14  ;;  %v4266_v10 = vld [vmem:[#allocation53_spill] sm:$0xff] }
 0x1cf   :  { %4255 = vst [vmem:[#allocation38_spill] sm:$0xff] %v3366_v44  ;;  %v3381_v4 = vmul.f32 %v3366_v44, %v3278_v54  ;;  %v550_v44 = vmul.f32 %v538_v8, %v3341_v59 }
 0x1d0   :  { %4256 = vst [vmem:[#allocation49_spill] sm:$0xff] %v3370_v48  ;;  %2033 = vset.pattern.permute.xlu1 %v4260_v51  ;;  %v3385_v6 = vpop.permute.xlu1 %754  ;;  %v518_v17 = vmul.f32 %v514_v16, %v3334_v23  ;;  %v4265_v48 = vsub.f32 %v3096_v62, %v3103_v5 }
 0x1d1   :  { %4258 = vst [vmem:[#allocation16_spill] sm:$0xff] %v3381_v4  ;;  %1118 = vperm.xlu1 %2033, %v3140_v43   ;;  %v1755_v4 = vsel %vm444_vm13, 1.0, %v4134_v30  ;;  %v3401_v43 = vmul.f32 %v4263_v63, %v2543_v12  ;;  %v578_v7 = vsub.f32 %v550_v44, %v574_v18 }
 0x1d4   :  { %v759_v37 = vpop.permute.xlu1 %758 }
 0x1d5   :  { %v3394_v21 = vmul.f32 %v1755_v4, %v759_v37  ;;  %2035 = vset.pattern.permute.xlu1 %v2094_v46  ;;  %v546_v37 = vsub.f32 %v518_v17, %v542_v25  ;;  %v4264_v46 = vld [vmem:[#allocation22_spill] sm:$0xff]  ;;  %v878_v25 = vmul.f32 %v4266_v10, %v578_v7  ;;  %v4267_v17 = vld [vmem:[#allocation60_spill] sm:$0xff]  ;;  %v4272_v10 = vld [vmem:[#allocation7_spill] sm:$0xff] }
 0x1d6   :  { %1370 = vperm.xlu1 %2035, %v3248_v0   ;;  %v3413_v8 = vsub.f32 %v2663_v36, %v4264_v46  ;;  %v1294_v16 = vmul.f32 %v4267_v17, %v2672_v50 }
 0x1d7   :  { %v3405_v47 = vmul.f32 %v3394_v21, %v3358_v40  ;;  %v854_v63 = vmul.f32 %v3124_v33, %v546_v37  ;;  %v882_v5 = vmul.f32 %v878_v25, %v2681_v14  ;;  %v3436_v37 = vpop.permute.xlu0 %782  ;;  %v890_v17 = vmul.f32 %v878_v25, %v3341_v59  ;;  %v4277_v25 = vld [vmem:[#allocation69_spill] sm:$0xff] }
 0x1d8   :  { %vm438_vm14 = vcmp.lt.f32.partialorder %v3413_v8, 0.0 }
 0x1d9   :  { %v1303_v4 = vpop.permute.xlu1 %1302  ;;  %v858_v44 = vmul.f32 %v854_v63, %v3334_v23  ;;  %vm442_vm15 = vmand %vm434_vm12, %vm438_vm14  ;;  %vm435_vm12 = vcmp.ge.f32.partialorder %v3202_v34, 0.0 }
 0x1da   :  { %v3419_v3 = vmul.f32 %v1303_v4, %v4265_v48  ;;  %1374 = vperm.xlu1 %2035, %v3033_v15   ;;  %v4268_v48 = vld [vmem:[#allocation20_spill] sm:$0xff]  ;;  %v1753_v4 = vsel %vm442_vm15, 1.0, %v4134_v30  ;;  %vm456_vm15 = vcmp.ge.f32.partialorder %v3358_v40, 0.0 }
 0x1db   :  { %v4269_v7 = vsub.f32 %v3121_v20, %v4268_v48  ;;  %v886_v46 = vsub.f32 %v858_v44, %v882_v5  ;;  %v3447_v20 = vsub.f32 %v2947_v27, %v4272_v10  ;;  %v4278_v5 = vld [vmem:[#allocation83_spill] sm:$0xff] }
 0x1dc   :  { %v1318_v36 = vmul.f32 %v3419_v3, %v2880_v60 }
 0x1dd   :  { %vm279_vm2 = vcmp.lt.f32.partialorder %v3447_v20, 0.0  ;;  %vm295_vm3 = vcmp.ge.f32.partialorder %v3447_v20, 0.0 }
 0x1de   :  { %v1322_v33 = vsub.f32 %v1294_v16, %v1318_v36  ;;  %2036 = vset.pattern.permute.xlu1 %v4260_v51  ;;  %v1147_v62 = vpop.permute.xlu1 %1146  ;;  %v914_v16 = vmul.f32 %v3220_v58, %v2672_v50  ;;  %v4270_v51 = vsub.f32 %v3178_v55, %v3184_v22  ;;  %v4273_v36 = vsub.f32 %v3209_v31, %v3212_v39  ;;  %v4274_v55 = vld [vmem:[#allocation2_spill] sm:$0xff]  ;;  %v3463_v58 = vld [vmem:[%s3945_s0 + $0x18] sm:$0xff]  ;;  %v4276_v31 = vld [vmem:[#allocation40_spill] sm:$0xff] }
 0x1df   :  { %1130 = vperm.xlu1 %2036, %v3033_v15   ;;  %v4271_v15 = vmov 32   ;;  %v3458_v22 = vsub.f32 %v2947_v27, %v4274_v55  ;;  %v3471_v39 = vmul.f32 %v1753_v4, %v4276_v31  ;;  %vm303_vm5 = vmand %vm295_vm3, %vm299_vm0  ;;  %vm454_vm3 = vcmp.ge.f32.partialorder %v3413_v8, 0.0 }
 0x1e0   :  { %v1868_v18 = vpack.c.bf16 %v1322_v33, %v4269_v7  ;;  %v1161_v63 = vmul.f32 %v1147_v62, %v4270_v51  ;;  %v4275_v33 = vld [vmem:[#allocation4_spill] sm:$0xff]  ;;  %v1450_v51 = vld [vmem:[%s3946_s3 + $0x8] sm:$0xff] }
 0x1e1   :  { %v3467_v62 = vsub.f32 %v3463_v58, %v4275_v33  ;;  %1562 = vmatprep.mubr.f32.mxu0 %v1450_v51  ;;  %v766_v55 = vmul.f32 %v3471_v39, %v3413_v8  ;;  %vm275_vm6 = vcmp.ge.f32.partialorder %v3458_v22, 0.0 }
 0x1e2   :  { %1869 = vmatprep.subr.bf16.mxu0 %v1868_v18  ;;  %1902 = vmatprep.subr.bf16.mxu1 %v1868_v18  ;;  %v1165_v48 = vmul.f32 %v1161_v63, %v4278_v5  ;;  %v918_v18 = vsub.f32 %v890_v17, %v914_v16  ;;  %v3493_v16 = vld [vmem:[%s3945_s0] sm:$0xff]  ;;  %v4283_v63 = vld [vmem:[#allocation24_spill] sm:$0xff]  ;;  %vm283_vm8 = vmand %vm275_vm6, %vm279_vm2 }
 0x1e3   :  { %2038 = vset.pattern.permute.xlu1 %v4271_v15  ;;  %v1171_v14 = vpop.permute.xlu1 %1170  ;;  %v4279_v15 = vld [vmem:[#allocation74_spill] sm:$0xff]  ;;  %4282 = vst [vmem:[#allocation21_spill] sm:$0xff] %v3493_v16  ;;  %v3497_v17 = vsub.f32 %v3493_v16, %v4283_v63  ;;  %vm276_vm4 = vcmp.ge.f32.partialorder %v3467_v62, 0.0  ;;  %v4284_v5 = vld [vmem:[#allocation81_spill] sm:$0xff] }
 0x1e4   :  { %v3453_v44 = vmul.f32 %v1171_v14, %v4273_v36  ;;  %1398 = vperm.xlu1 %2038, %v3195_v57   ;;  %v1162_v57 = vmul.f32 %v4277_v25, %v886_v46  ;;  %v4280_v14 = vld [vmem:[#allocation15_spill] sm:$0xff]  ;;  %v3483_v36 = vpop.permute.xlu0 %786  ;;  %vm284_vm7 = vmand %vm276_vm4, %vm280_vm1  ;;  %vm453_vm9 = vcmp.ge.f32.partialorder %v4284_v5, 0.0 }
 0x1e5   :  { %v742_v10 = vmul.f32 %v4280_v14, %v4279_v15  ;;  %4281 = vst [vmem:[#allocation39_spill] sm:$0xff] %v3483_v36  ;;  %v1723_v54 = vsel %vm284_vm7, 1.0, %v4134_v30  ;;  %vm457_vm10 = vcmp.lt.f32.partialorder %v3497_v17, 0.0  ;;  %v4289_v15 = vld [vmem:[#allocation71_spill] sm:$0xff] }
 0x1e6   :  { %v1189_v7 = vmul.f32 %v3453_v44, %v2668_v49  ;;  %vm461_vm11 = vmand %vm453_vm9, %vm457_vm10 }
 0x1e7   :  { %v1175_v4 = vpop.permute.xlu1 %1174  ;;  %v770_v25 = vsub.f32 %v742_v10, %v766_v55  ;;  %v4287_v10 = vld [vmem:[#allocation31_spill] sm:$0xff]  ;;  %v4288_v55 = vld [vmem:[#allocation30_spill] sm:$0xff] }
 0x1e8   :  { %v1193_v46 = vsub.f32 %v1165_v48, %v1189_v7  ;;  %v3487_v49 = vmul.f32 %v1175_v4, %v918_v18  ;;  %1402 = vperm.xlu1 %2038, %v3248_v0   ;;  %v1166_v0 = vmul.f32 %v1162_v57, %v3334_v23  ;;  %v1335_v31 = vpop.permute.xlu0 %1334  ;;  %v1468_v48 = vld [vmem:[%s3946_s3 + $0x98] sm:$0xff]  ;;  %v1726_v7 = vsel %vm303_vm5, 1.0, %v4134_v30  ;;  %v4285_v23 = vld [vmem:[#allocation34_spill] sm:$0xff] }
 0x1e9   :  { %1592 = vmatprep.mubr.f32.mxu1 %v1468_v48  ;;  %v539_v57 = vmul.f32 %v1726_v7, %v4285_v23  ;;  %v516_v4 = vmul.f32 %v1723_v54, %v4287_v10  ;;  %v1756_v54 = vsel %vm461_vm11, 1.0, %v4134_v30  ;;  %v575_v10 = vmul.f32 %v3337_v42, %v2962_v24 }
 0x1ea   :  { %v1190_v33 = vmul.f32 %v3487_v49, %v2672_v50  ;;  %v1722_v50 = vsel %vm283_vm8, 1.0, %v4134_v30  ;;  %v3552_v42 = vmul.f32 %v3419_v3, %v2689_v35  ;;  %vm473_vm8 = vcmp.ge.f32.partialorder %v3497_v17, 0.0 }
 0x1eb   :  { %v515_v36 = vmul.f32 %v1722_v50, %v4288_v55 }
 0x1ec   :  { %v1194_v18 = vsub.f32 %v1166_v0, %v1190_v33  ;;  %v1059_v51 = vpop.permute.xlu1 %1058  ;;  %v4290_v0 = vld [vmem:[#allocation19_spill] sm:$0xff]  ;;  %v3528_v7 = vpop.permute.xlu0 %1342 }
 0x1ed   :  { %v3517_v14 = vmul.f32 %v1059_v51, %v770_v25  ;;  %v1050_v33 = vmul.f32 %v4290_v0, %v4289_v15  ;;  %v543_v25 = vmul.f32 %v539_v57, %v3303_v32  ;;  %v519_v50 = vmul.f32 %v515_v36, %v3458_v22  ;;  %v4291_v0 = vld [vmem:[#allocation23_spill] sm:$0xff] }
 0x1ee   :  { %v1870_v63 = vpack.c.bf16 %v1194_v18, %v1193_v46  ;;  %v520_v46 = vmul.f32 %v516_v4, %v3467_v62  ;;  %v551_v36 = vmul.f32 %v539_v57, %v3447_v20 }
 0x1ef   :  { %4286 = vst [vmem:[#allocation32_spill] sm:$0xff] %v3517_v14  ;;  %v1074_v48 = vmul.f32 %v3517_v14, %v3413_v8  ;;  %v4293_v14 = vld [vmem:[#allocation48_spill] sm:$0xff] }
 0x1f0   :  { %1871 = vmatpush3.bf16.msra.mxu0 %v1870_v63  ;;  %1910 = vmatpush3.bf16.msra.mxu1 %v1870_v63  ;;  %v544_v63 = vmul.f32 %v3321_v1, %v4244_v38 }
 0x1f1   :  { %v1078_v51 = vsub.f32 %v1050_v33, %v1074_v48  ;;  %v779_v23 = vpop.permute.xlu1 %778  ;;  %v3543_v33 = vsub.f32 %v2947_v27, %v4291_v0  ;;  %v4292_v48 = vld [vmem:[#allocation45_spill] sm:$0xff]  ;;  %v1087_v0 = vpop.permute.xlu0 %1086 }
 0x1f2   :  { %v3532_v18 = vmul.f32 %v1756_v54, %v779_v23  ;;  %v773_v16 = vmul.f32 %v4293_v14, %v4292_v48  ;;  %v547_v23 = vsub.f32 %v519_v50, %v543_v25  ;;  %v579_v54 = vsub.f32 %v551_v36, %v575_v10  ;;  %v4295_v50 = vld [vmem:[#allocation58_spill] sm:$0xff] }
 0x1f3   :  { %v3537_v55 = vmul.f32 %v1335_v31, %v1078_v51  ;;  %v548_v31 = vsub.f32 %v520_v46, %v544_v63  ;;  %v4294_v48 = vsub.f32 %v3306_v29, %v3310_v61  ;;  %vm439_vm13 = vcmp.lt.f32.partialorder %v3543_v33, 0.0  ;;  %v4296_v61 = vld [vmem:[#allocation43_spill] sm:$0xff]  ;;  %v4297_v63 = vld [vmem:[#allocation17_spill] sm:$0xff] }
 0x1f4   :  { %v797_v4 = vmul.f32 %v3532_v18, %v3497_v17  ;;  %v855_v14 = vmul.f32 %v3314_v9, %v547_v23  ;;  %v879_v46 = vmul.f32 %v4295_v50, %v579_v54  ;;  %v1295_v10 = vmul.f32 %v3267_v56, %v2984_v19  ;;  %vm443_vm14 = vmand %vm435_vm12, %vm439_vm13  ;;  %v4298_v23 = vld [vmem:[#allocation75_spill] sm:$0xff]  ;;  %v4301_v54 = vld [vmem:[#allocation73_spill] sm:$0xff] }
 0x1f5   :  { %v3556_v1 = vmul.f32 %v3537_v55, %v3413_v8  ;;  %v1296_v50 = vmul.f32 %v3282_v2, %v4237_v53  ;;  %vm455_vm6 = vcmp.ge.f32.partialorder %v3543_v33, 0.0 }
 0x1f6   :  { %v801_v27 = vsub.f32 %v773_v16, %v797_v4  ;;  %v1307_v51 = vpop.permute.xlu1 %1306  ;;  %v856_v16 = vmul.f32 %v3326_v28, %v548_v31  ;;  %v859_v36 = vmul.f32 %v855_v14, %v3458_v22  ;;  %v884_v28 = vmul.f32 %v3345_v26, %v4243_v11  ;;  %v4299_v31 = vld [vmem:[#allocation64_spill] sm:$0xff] }
 0x1f7   :  { %v3562_v57 = vmul.f32 %v1307_v51, %v4294_v48  ;;  %v3578_v48 = vmul.f32 %v4297_v63, %v4296_v61  ;;  %v1754_v26 = vsel %vm443_vm14, 1.0, %v4134_v30 }
 0x1f8   :  { %v3567_v25 = vmul.f32 %v1087_v0, %v801_v27  ;;  %v4300_v27 = vsub.f32 %v4298_v23, %v4299_v31  ;;  %v883_v0 = vmul.f32 %v879_v46, %v2962_v24  ;;  %v860_v63 = vmul.f32 %v856_v16, %v3467_v62 }
 0x1f9   :  { %v1319_v9 = vmul.f32 %v3562_v57, %v3202_v34  ;;  %v3601_v31 = vmul.f32 %v1754_v26, %v3385_v6  ;;  %v891_v24 = vmul.f32 %v879_v46, %v3447_v20  ;;  %v743_v6 = vmul.f32 %v3258_v52, %v3039_v45 }
 0x1fa   :  { %v1311_v29 = vpop.permute.xlu1 %1310  ;;  %v3582_v4 = vmul.f32 %v3567_v25, %v3497_v17  ;;  %v887_v11 = vsub.f32 %v859_v36, %v883_v0  ;;  %v888_v23 = vsub.f32 %v860_v63, %v884_v28  ;;  %v4302_v28 = vld [vmem:[#allocation38_spill] sm:$0xff] }
 0x1fb   :  { %v1323_v56 = vsub.f32 %v1295_v10, %v1319_v9  ;;  %v1316_v51 = vmul.f32 %v1311_v29, %v4300_v27  ;;  %v915_v10 = vmul.f32 %v3362_v41, %v2984_v19  ;;  %v767_v36 = vmul.f32 %v3601_v31, %v3543_v33 }
 0x1fc   :  { %v1163_v16 = vmul.f32 %v4301_v54, %v887_v11  ;;  %v1192_v46 = vmul.f32 %v4302_v28, %v4237_v53  ;;  %v4305_v53 = vld [vmem:[#allocation41_spill] sm:$0xff] }
 0x1fd   :  { %v1320_v14 = vmul.f32 %v1316_v51, %v4261_v13  ;;  %v919_v3 = vsub.f32 %v891_v24, %v915_v10 }
 0x1ff   :  { %v1324_v9 = vsub.f32 %v1296_v50, %v1320_v14  ;;  %v1159_v29 = vpop.permute.xlu1 %1158  ;;  %v771_v14 = vsub.f32 %v743_v6, %v767_v36 }
 0x200   :  { %v1164_v27 = vmul.f32 %v1159_v29, %v888_v23  ;;  %v4304_v29 = vld [vmem:[#allocation42_spill] sm:$0xff] }
 0x201   :  { %v1872_v2 = vpack.c.bf16 %v1324_v9, %v1323_v56  ;;  %v1167_v56 = vmul.f32 %v1163_v16, %v3458_v22  ;;  %v4303_v9 = vld [vmem:[#allocation26_spill] sm:$0xff]  ;;  %v3625_v23 = vmul.f32 %v4305_v53, %v4304_v29  ;;  %v4306_v22 = vsub.f32 %v3401_v43, %v3405_v47  ;;  %v4308_v16 = vld [vmem:[#allocation59_spill] sm:$0xff] }
 0x202   :  { %v1168_v41 = vmul.f32 %v1164_v27, %v3467_v62  ;;  %v3619_v62 = vsub.f32 %v3463_v58, %v4303_v9  ;;  %v776_v43 = vmul.f32 %v3394_v21, %v4261_v13  ;;  %v4310_v9 = vld [vmem:[#allocation12_spill] sm:$0xff]  ;;  %v4313_v21 = vld [vmem:[#allocation70_spill] sm:$0xff] }
 0x203   :  { %1873 = vmatprep.subr.bf16.mxu0 %v1872_v2  ;;  %1903 = vmatprep.subr.bf16.mxu1 %v1872_v2  ;;  %v4307_v2 = vld [vmem:[#allocation52_spill] sm:$0xff] }
 0x204   :  { %v1179_v0 = vpop.permute.xlu1 %1178  ;;  %v1196_v26 = vsub.f32 %v1168_v41, %v1192_v46  ;;  %vm460_vm0 = vcmp.lt.f32.partialorder %v3619_v62, 0.0  ;;  %v1052_v36 = vmul.f32 %v4308_v16, %v4307_v2  ;;  %vm476_vm14 = vcmp.ge.f32.partialorder %v3619_v62, 0.0 }
 0x205   :  { %v1187_v50 = vmul.f32 %v1179_v0, %v919_v3  ;;  %vm464_vm1 = vmand %vm456_vm15, %vm460_vm0 }
 0x206   :  { %v1759_v6 = vsel %vm464_vm1, 1.0, %v4134_v30 }
 0x207   :  { %v1191_v54 = vmul.f32 %v1187_v50, %v2984_v19  ;;  %v3615_v63 = vmul.f32 %v1187_v50, %v3447_v20 }
 0x209   :  { %v1195_v11 = vsub.f32 %v1167_v56, %v1191_v54  ;;  %v1063_v10 = vpop.permute.xlu1 %1062  ;;  %v4309_v56 = vld [vmem:[#allocation63_spill] sm:$0xff] }
 0x20a   :  { %v3621_v3 = vmul.f32 %v1063_v10, %v771_v14  ;;  %v1328_v54 = vmul.f32 %v1316_v51, %v4309_v56  ;;  %v1099_v10 = vpop.permute.xlu0 %1098 }
 0x20b   :  { %v1874_v52 = vpack.c.bf16 %v1196_v26, %v1195_v11 }
 0x20c   :  { %v1075_v19 = vmul.f32 %v3621_v3, %v3543_v33 }
 0x20d   :  { %v1067_v20 = vpop.permute.xlu1 %1066  ;;  %1875 = vmatpush3.bf16.msra.mxu0 %v1874_v52  ;;  %1911 = vmatpush3.bf16.msra.mxu1 %v1874_v52  ;;  %v4311_v52 = vld [vmem:[#allocation18_spill] sm:$0xff] }
 0x20e   :  { %v1072_v24 = vmul.f32 %v1067_v20, %v4306_v22  ;;  %v1079_v27 = vsub.f32 %v3625_v23, %v1075_v19  ;;  %v4312_v53 = vsub.f32 %v4310_v9, %v4311_v52  ;;  %v4314_v20 = vld [vmem:[#allocation66_spill] sm:$0xff]  ;;  %v4320_v9 = vld [vmem:[#allocation84_spill] sm:$0xff] }
 0x20f   :  { %v1325_v22 = vmul.f32 %v4314_v20, %v4313_v21  ;;  %v4322_v20 = vld [vmem:[#allocation51_spill] sm:$0xff] }
 0x210   :  { %v1076_v0 = vmul.f32 %v1072_v24, %v3358_v40  ;;  %v3663_v16 = vmul.f32 %v1072_v24, %v2543_v12 }
 0x212   :  { %v1080_v41 = vsub.f32 %v1052_v36, %v1076_v0  ;;  %v791_v50 = vpop.permute.xlu1 %790 }
 0x213   :  { %v3639_v28 = vmul.f32 %v1759_v6, %v791_v50  ;;  %v4315_v50 = vld [vmem:[#allocation54_spill] sm:$0xff]  ;;  %v4316_v6 = vld [vmem:[#allocation55_spill] sm:$0xff] }
 0x214   :  { %v3642_v46 = vmul.f32 %v3528_v7, %v1080_v41 }
 0x215   :  { %v800_v47 = vmul.f32 %v3639_v28, %v3619_v62 }
 0x216   :  { %v1352_v14 = vmul.f32 %v3642_v46, %v3358_v40 }
 0x217   :  { %v804_v26 = vsub.f32 %v776_v43, %v800_v47  ;;  %v1331_v11 = vpop.permute.xlu1 %1330  ;;  %v4317_v43 = vsub.f32 %v4315_v50, %v4316_v6  ;;  %v4323_v6 = vld [vmem:[#allocation29_spill] sm:$0xff] }
 0x218   :  { %v3654_v23 = vmul.f32 %v1331_v11, %v4312_v53  ;;  %v1356_v7 = vsub.f32 %v1328_v54, %v1352_v14  ;;  %v4318_v14 = vsub.f32 %v3552_v42, %v3556_v1  ;;  %v4319_v11 = vld [vmem:[#allocation82_spill] sm:$0xff]  ;;  %v239_v1 = vpop.permute.xlu0 %238 }
 0x219   :  { %v3656_v19 = vmul.f32 %v1099_v10, %v804_v26  ;;  %v1197_v24 = vmul.f32 %v3453_v44, %v4319_v11  ;;  %v4321_v53 = vld [vmem:[#allocation46_spill] sm:$0xff] }
 0x21a   :  { %v1349_v51 = vmul.f32 %v3654_v23, %v4284_v5 }
 0x21b   :  { %v3667_v36 = vmul.f32 %v3656_v19, %v3619_v62 }
 0x21c   :  { %v1353_v0 = vsub.f32 %v1325_v22, %v1349_v51  ;;  %v1203_v41 = vpop.permute.xlu1 %1202  ;;  %v1253_v22 = vmul.f32 %v4322_v20, %v4321_v53 }
 0x21d   :  { %v1217_v47 = vmul.f32 %v1203_v41, %v4317_v43  ;;  %v4324_v43 = vld [vmem:[#allocation47_spill] sm:$0xff] }
 0x21e   :  { %v1876_v26 = vpack.c.bf16 %v4318_v14, %v1353_v0  ;;  %v4325_v54 = vsub.f32 %v4323_v6, %v4324_v43  ;;  %v4326_v0 = vld [vmem:[#allocation85_spill] sm:$0xff]  ;;  %v4327_v14 = vld [vmem:[#allocation14_spill] sm:$0xff] }
 0x21f   :  { %v1221_v10 = vmul.f32 %v1217_v47, %v4313_v21  ;;  %v1229_v52 = vmul.f32 %v1217_v47, %v4320_v9  ;;  %v1254_v44 = vmul.f32 %v4326_v0, %v4289_v15  ;;  %v1198_v21 = vmul.f32 %v3487_v49, %v3341_v59  ;;  %v4328_v49 = vld [vmem:[#allocation37_spill] sm:$0xff] }
 0x220   :  { %v1207_v51 = vpop.permute.xlu1 %1206  ;;  %1877 = vmatprep.subr.bf16.mxu0 %v1876_v26  ;;  %1904 = vmatprep.subr.bf16.mxu1 %v1876_v26  ;;  %v4329_v43 = vld [vmem:[#allocation49_spill] sm:$0xff] }
 0x221   :  { %v1225_v41 = vsub.f32 %v1197_v24, %v1221_v10  ;;  %v1257_v50 = vsub.f32 %v1229_v52, %v1253_v22  ;;  %v1218_v42 = vmul.f32 %v1207_v51, %v4325_v54  ;;  %v2061_v24 = vld [vmem:[%s3945_s0 + $0x8] sm:$0xff]  ;;  %v1327_v22 = vmul.f32 %v3562_v57, %v4328_v49 }
 0x222   :  { %v3695_v10 = vsub.f32 %v2061_v24, %v239_v1 }
 0x223   :  { %v1222_v47 = vmul.f32 %v1218_v42, %v2689_v35  ;;  %v1230_v11 = vmul.f32 %v1218_v42, %v4327_v14  ;;  %v4330_v42 = vld [vmem:[#allocation56_spill] sm:$0xff] }
 0x224   :  { %vm458_vm2 = vcmp.lt.f32.partialorder %v3695_v10, 0.0  ;;  %v4331_v1 = vsub.f32 %v4329_v43, %v4330_v42  ;;  %vm474_vm11 = vcmp.ge.f32.partialorder %v3695_v10, 0.0 }
 0x225   :  { %v1226_v9 = vsub.f32 %v1198_v21, %v1222_v47  ;;  %v1258_v20 = vsub.f32 %v1230_v11, %v1254_v44  ;;  %v1091_v26 = vpop.permute.xlu1 %1090  ;;  %vm462_vm4 = vmand %vm454_vm3, %vm458_vm2 }
 0x227   :  { %v1878_v54 = vpack.c.bf16 %v1226_v9, %v1225_v41  ;;  %v3697_v52 = vpack.c.bf16 %v1258_v20, %v1257_v50  ;;  %v1757_v50 = vsel %vm462_vm4, 1.0, %v4134_v30  ;;  %vm1473_vm4 = vcmask 261120  }
 0x228   :  { %v3716_v14 = vmul.f32 %v1757_v50, %v3436_v37 }
 0x229   :  { %1879 = vmatpush3.bf16.msra.mxu0 %v1878_v54  ;;  %1912 = vmatpush3.bf16.msra.mxu1 %v1878_v54  ;;  %v4333_v54 = vld [vmem:[#allocation78_spill] sm:$0xff] }
 0x22a   :  { %v1339_v59 = vpop.permute.xlu1 %1338  ;;  %v798_v37 = vmul.f32 %v3716_v14, %v3695_v10 }
 0x22b   :  { %v3700_v35 = vmul.f32 %v1339_v59, %v1079_v27  ;;  %v4332_v27 = vld [vmem:[#allocation35_spill] sm:$0xff] }
 0x22c   :  { %v1255_v21 = vmul.f32 %v4332_v27, %v4304_v29  ;;  %v4334_v59 = vld [vmem:[#allocation79_spill] sm:$0xff] }
 0x22d   :  { %v1351_v51 = vmul.f32 %v3700_v35, %v3543_v33 }
 0x22f   :  { %v1355_v6 = vsub.f32 %v1327_v22, %v1351_v51  ;;  %v1211_v41 = vpop.permute.xlu1 %1210  ;;  %v4335_v22 = vsub.f32 %v4333_v54, %v4334_v59  ;;  %v4336_v51 = vld [vmem:[#allocation61_spill] sm:$0xff]  ;;  %v811_v59 = vpop.permute.xlu0 %810 }
 0x230   :  { %v1219_v0 = vmul.f32 %v1211_v41, %v4331_v1  ;;  %v4337_v41 = vld [vmem:[#allocation16_spill] sm:$0xff]  ;;  %v4338_v1 = vld [vmem:[#allocation25_spill] sm:$0xff] }
 0x231   :  { %v1880_v44 = vpack.c.bf16 %v1356_v7, %v1355_v6  ;;  %v1256_v6 = vmul.f32 %v4336_v51, %v4307_v2  ;;  %v4343_v51 = vsub.f32 %v3578_v48, %v3582_v4  ;;  %v775_v48 = vmul.f32 %v3601_v31, %v3202_v34 }
 0x232   :  { %v1223_v47 = vmul.f32 %v1219_v0, %v4328_v49  ;;  %v1231_v57 = vmul.f32 %v1219_v0, %v3303_v32 }
 0x233   :  { %v1215_v11 = vpop.permute.xlu1 %1214  ;;  %1881 = vmatprep.subr.bf16.mxu0 %v1880_v44  ;;  %1905 = vmatprep.subr.bf16.mxu1 %v1880_v44  ;;  %v774_v44 = vmul.f32 %v3471_v39, %v2880_v60 }
 0x234   :  { %v1227_v9 = vsub.f32 %v3615_v63, %v1223_v47  ;;  %v1259_v20 = vsub.f32 %v1231_v57, %v1255_v21  ;;  %v1220_v7 = vmul.f32 %v1215_v11, %v4335_v22  ;;  %v2062_v63 = vld [vmem:[%s3945_s0 + $0x10] sm:$0xff]  ;;  %v4339_v57 = vld [vmem:[#allocation3_spill] sm:$0xff]  ;;  %v4340_v11 = vld [vmem:[#allocation21_spill] sm:$0xff] }
 0x235   :  { %v3733_v0 = vsub.f32 %v2062_v63, %v4338_v1  ;;  %v3744_v54 = vsub.f32 %v4340_v11, %v4339_v57  ;;  %v4342_v22 = vld [vmem:[#allocation32_spill] sm:$0xff] }
 0x236   :  { %v1224_v49 = vmul.f32 %v1220_v7, %v4309_v56  ;;  %v1232_v32 = vmul.f32 %v1220_v7, %v4244_v38  ;;  %v802_v38 = vsub.f32 %v774_v44, %v798_v37  ;;  %v819_v37 = vpop.permute.xlu0 %818 }
 0x237   :  { %vm459_vm5 = vcmp.lt.f32.partialorder %v3733_v0, 0.0  ;;  %vm477_vm9 = vcmp.lt.f32.partialorder %v3744_v54, 0.0  ;;  %vm475_vm1 = vcmp.ge.f32.partialorder %v3733_v0, 0.0 }
 0x238   :  { %v1228_v50 = vsub.f32 %v4337_v41, %v1224_v49  ;;  %v1260_v43 = vsub.f32 %v1232_v32, %v1256_v6  ;;  %v815_v42 = vpop.permute.xlu1 %814  ;;  %v3740_v21 = vmul.f32 %v1091_v26, %v802_v38  ;;  %vm463_vm7 = vmand %vm455_vm6, %vm459_vm5  ;;  %v4344_v49 = vld [vmem:[#allocation39_spill] sm:$0xff] }
 0x239   :  { %v1758_v26 = vsel %vm463_vm7, 1.0, %v4134_v30  ;;  %v4345_v41 = vld [vmem:[#allocation27_spill] sm:$0xff]  ;;  %vm481_vm10 = vmand %vm473_vm8, %vm477_vm9 }
 0x23a   :  { %v1882_v56 = vpack.c.bf16 %v1228_v50, %v1227_v9  ;;  %v3737_v27 = vpack.c.bf16 %v1260_v43, %v1259_v20  ;;  %v1106_v39 = vmul.f32 %v3740_v21, %v3695_v10  ;;  %v4341_v20 = vld [vmem:[#allocation74_spill] sm:$0xff]  ;;  %v3760_v32 = vmul.f32 %v1758_v26, %v4344_v49  ;;  %v4347_v26 = vld [vmem:[#allocation28_spill] sm:$0xff] }
 0x23b   :  { %v1082_v7 = vmul.f32 %v4342_v22, %v4341_v20  ;;  %v3763_v50 = vsub.f32 %v2061_v24, %v4345_v41  ;;  %v1357_v43 = vmul.f32 %v3654_v23, %v4321_v53  ;;  %v1760_v57 = vsel %vm481_vm10, 1.0, %v4134_v30  ;;  %v4346_v23 = vld [vmem:[#allocation5_spill] sm:$0xff] }
 0x23c   :  { %1883 = vmatpush3.bf16.msra.mxu0 %v1882_v56  ;;  %1913 = vmatpush3.bf16.msra.mxu1 %v1882_v56  ;;  %v799_v24 = vmul.f32 %v3760_v32, %v3733_v0  ;;  %v825_v11 = vmul.f32 %v1760_v57, %v811_v59  ;;  %v3784_v53 = vsub.f32 %v3463_v58, %v4346_v23 }
 0x23d   :  { %v1095_v47 = vpop.permute.xlu1 %1094  ;;  %v1110_v44 = vsub.f32 %v1082_v7, %v1106_v39  ;;  %vm478_vm13 = vcmp.lt.f32.partialorder %v3763_v50, 0.0  ;;  %v1123_v39 = vpop.permute.xlu0 %1122  ;;  %v3787_v22 = vsub.f32 %v2062_v63, %v4347_v26  ;;  %v805_v59 = vmul.f32 %v3532_v18, %v4284_v5 }
 0x23e   :  { %vm482_vm12 = vmand %vm474_vm11, %vm478_vm13  ;;  %vm480_vm15 = vcmp.lt.f32.partialorder %v3784_v53, 0.0 }
 0x23f   :  { %vm479_vm0 = vcmp.lt.f32.partialorder %v3787_v22, 0.0  ;;  %vm484_vm2 = vmand %vm476_vm14, %vm480_vm15 }
 0x240   :  { %vm483_vm3 = vmand %vm475_vm1, %vm479_vm0 }
 0x241   :  { %v1127_v63 = vpop.permute.xlu0 %1126  ;;  %v1762_v57 = vsel %vm483_vm3, 1.0, %v4134_v30 }
 0x242   :  { %v1363_v9 = vpop.permute.xlu1 %1362 }
 0x243   :  { %v3757_v6 = vmul.f32 %v1363_v9, %v4343_v51  ;;  %v803_v9 = vsub.f32 %v775_v48, %v799_v24 }
 0x245   :  { %v1381_v1 = vmul.f32 %v3757_v6, %v3497_v17  ;;  %v1358_v17 = vmul.f32 %v3537_v55, %v4289_v15  ;;  %v1103_v49 = vmul.f32 %v1095_v47, %v803_v9  ;;  %v829_v15 = vmul.f32 %v825_v11, %v3744_v54  ;;  %v1395_v24 = vpop.permute.xlu0 %1394 }
 0x246   :  { %v1367_v4 = vpop.permute.xlu1 %1366  ;;  %v1761_v55 = vsel %vm482_vm12, 1.0, %v4134_v30  ;;  %v1083_v47 = vmul.f32 %v3621_v3, %v3039_v45  ;;  %v827_v3 = vmul.f32 %v1762_v57, %v819_v37  ;;  %v4349_v37 = vsub.f32 %v3663_v16, %v3667_v36 }
 0x247   :  { %v1385_v56 = vsub.f32 %v1357_v43, %v1381_v1  ;;  %v3772_v38 = vmul.f32 %v1367_v4, %v1110_v44  ;;  %v826_v41 = vmul.f32 %v1761_v55, %v815_v42  ;;  %v833_v58 = vsub.f32 %v805_v59, %v829_v15  ;;  %v4348_v44 = vld [vmem:[#allocation45_spill] sm:$0xff] }
 0x248   :  { %v1107_v5 = vmul.f32 %v1103_v49, %v3733_v0  ;;  %v1113_v48 = vmul.f32 %v3567_v25, %v4348_v44  ;;  %v806_v4 = vmul.f32 %v3716_v14, %v3413_v8  ;;  %v1359_v59 = vmul.f32 %v3700_v35, %v4304_v29 }
 0x249   :  { %v1382_v31 = vmul.f32 %v3772_v38, %v3695_v10  ;;  %v830_v43 = vmul.f32 %v826_v41, %v3763_v50  ;;  %v1389_v8 = vmul.f32 %v3757_v6, %v4296_v61  ;;  %v808_v29 = vmul.f32 %v3639_v28, %v3358_v40 }
 0x24a   :  { %v807_v61 = vmul.f32 %v3760_v32, %v3543_v33  ;;  %v1114_v40 = vmul.f32 %v3740_v21, %v2880_v60  ;;  %v1116_v33 = vmul.f32 %v3656_v19, %v4261_v13  ;;  %v1449_v60 = vld [vmem:[%s3946_s3] sm:$0xff]  ;;  %v1467_v13 = vld [vmem:[%s3946_s3 + $0x90] sm:$0xff] }
 0x24b   :  { %v1386_v7 = vsub.f32 %v1358_v17, %v1382_v31  ;;  %v823_v51 = vpop.permute.xlu1 %822  ;;  %v834_v23 = vsub.f32 %v806_v4, %v830_v43  ;;  %v1453_v21 = vld [vmem:[%s3946_s3 + $0x20] sm:$0xff]  ;;  %v1452_v4 = vld [vmem:[%s3946_s3 + $0x18] sm:$0xff] }
 0x24d   :  { %v1884_v10 = vpack.c.bf16 %v1386_v7, %v1385_v56  ;;  %v1111_v56 = vsub.f32 %v1083_v47, %v1107_v5 }
 0x24f   :  { %1885 = vmatprep.subr.bf16.mxu0 %v1884_v10  ;;  %1906 = vmatprep.subr.bf16.mxu1 %v1884_v10  ;;  %v1134_v10 = vmul.f32 %v1123_v39, %v834_v23  ;;  %v1454_v23 = vld [vmem:[%s3946_s3 + $0x28] sm:$0xff] }
 0x250   :  { %v1119_v18 = vpop.permute.xlu1 %1118  ;;  %1887 = vmatpush3.bf16.msra.mxu0 %v3697_v52  ;;  %1914 = vmatpush3.bf16.msra.mxu1 %v3697_v52  ;;  %v1763_v52 = vsel %vm484_vm2, 1.0, %v4134_v30 }
 0x251   :  { %v1133_v42 = vmul.f32 %v1119_v18, %v833_v58  ;;  %v828_v11 = vmul.f32 %v1763_v52, %v823_v51  ;;  %v831_v51 = vmul.f32 %v827_v3, %v3787_v22  ;;  %v1138_v16 = vmul.f32 %v1134_v10, %v3763_v50  ;;  %v1456_v52 = vld [vmem:[%s3946_s3 + $0x38] sm:$0xff]  ;;  %v1462_v3 = vld [vmem:[%s3946_s3 + $0x68] sm:$0xff] }
 0x253   :  { %v1137_v1 = vmul.f32 %v1133_v42, %v3744_v54  ;;  %v832_v14 = vmul.f32 %v828_v11, %v3784_v53  ;;  %v835_v41 = vsub.f32 %v807_v61, %v831_v51  ;;  %v1455_v11 = vld [vmem:[%s3946_s3 + $0x30] sm:$0xff]  ;;  %v1472_v51 = vld [vmem:[%s3946_s3 + $0xb8] sm:$0xff] }
 0x255   :  { %v1371_v17 = vpop.permute.xlu1 %1370  ;;  %v1141_v31 = vsub.f32 %v1113_v48, %v1137_v1  ;;  %v836_v6 = vsub.f32 %v808_v29, %v832_v14  ;;  %v1135_v39 = vmul.f32 %v1127_v63, %v835_v41  ;;  %v1390_v63 = vmul.f32 %v3772_v38, %v4341_v20  ;;  %v1470_v20 = vld [vmem:[%s3946_s3 + $0xa8] sm:$0xff]  ;;  %v1464_v14 = vld [vmem:[%s3946_s3 + $0x78] sm:$0xff] }
 0x256   :  { %v1379_v9 = vmul.f32 %v1371_v17, %v1111_v56 }
 0x257   :  { %v1409_v26 = vmul.f32 %v1395_v24, %v1141_v31  ;;  %v1459_v31 = vld [vmem:[%s3946_s3 + $0x50] sm:$0xff] }
 0x258   :  { %v1383_v25 = vmul.f32 %v1379_v9, %v3733_v0  ;;  %v1360_v0 = vmul.f32 %v3642_v46, %v4307_v2  ;;  %v1115_v2 = vmul.f32 %v1103_v49, %v3202_v34  ;;  %v1142_v46 = vsub.f32 %v1114_v40, %v1138_v16  ;;  %v1471_v49 = vld [vmem:[%s3946_s3 + $0xb0] sm:$0xff] }
 0x259   :  { %v1413_v7 = vmul.f32 %v1409_v26, %v3744_v54  ;;  %v1375_v30 = vpop.permute.xlu1 %1374  ;;  %v1139_v34 = vmul.f32 %v1135_v39, %v3787_v22  ;;  %v1391_v56 = vmul.f32 %v1379_v9, %v3039_v45  ;;  %v1457_v9 = vld [vmem:[%s3946_s3 + $0x40] sm:$0xff] }
 0x25a   :  { %v1387_v15 = vsub.f32 %v1359_v59, %v1383_v25  ;;  %v1380_v55 = vmul.f32 %v1375_v30, %v4349_v37  ;;  %v1461_v26 = vld [vmem:[%s3946_s3 + $0x60] sm:$0xff]  ;;  %v1460_v25 = vld [vmem:[%s3946_s3 + $0x58] sm:$0xff] }
 0x25b   :  { %v1417_v35 = vsub.f32 %v1389_v8, %v1413_v7  ;;  %v1143_v43 = vsub.f32 %v1115_v2, %v1139_v34  ;;  %v1465_v59 = vld [vmem:[%s3946_s3 + $0x80] sm:$0xff]  ;;  %v1463_v8 = vld [vmem:[%s3946_s3 + $0x70] sm:$0xff]  ;;  %v1466_v7 = vld [vmem:[%s3946_s3 + $0x88] sm:$0xff] }
 0x25c   :  { %v1384_v54 = vmul.f32 %v1380_v55, %v3619_v62  ;;  %v1407_v62 = vpop.permute.xlu0 %1406  ;;  %v1392_v1 = vmul.f32 %v1380_v55, %v2543_v12  ;;  %v1451_v12 = vld [vmem:[%s3946_s3 + $0x10] sm:$0xff]  ;;  %v1469_v30 = vld [vmem:[%s3946_s3 + $0xa0] sm:$0xff] }
 0x25e   :  { %v1388_v58 = vsub.f32 %v1360_v0, %v1384_v54  ;;  %v1131_v5 = vpop.permute.xlu1 %1130 }
 0x25f   :  { %v1136_v36 = vmul.f32 %v1131_v5, %v836_v6 }
 0x260   :  { %v1888_v28 = vpack.c.bf16 %v1388_v58, %v1387_v15 }
 0x261   :  { %v1140_v18 = vmul.f32 %v1136_v36, %v3784_v53 }
 0x262   :  { %1889 = vmatprep.subr.bf16.mxu0 %v1888_v28  ;;  %1907 = vmatprep.subr.bf16.mxu1 %v1888_v28 }
 0x263   :  { %v1144_v32 = vsub.f32 %v1116_v33, %v1140_v18  ;;  %v1399_v42 = vpop.permute.xlu1 %1398  ;;  %1891 = vmatpush3.bf16.msra.mxu0 %v3737_v27  ;;  %1915 = vmatpush3.bf16.msra.mxu1 %v3737_v27 }
 0x264   :  { %v1410_v19 = vmul.f32 %v1399_v42, %v1142_v46 }
 0x265   :  { %v1412_v27 = vmul.f32 %v1407_v62, %v1144_v32 }
 0x266   :  { %v1414_v47 = vmul.f32 %v1410_v19, %v3763_v50  ;;  %1563 = vmatmul.mubr.f32.vlgmr.msra.gmra.mrb[0].mxu0 %v1449_v60  ;;  %1593 = vmatmul.mubr.f32.vlgmr.msra.gmra.mrb[0].mxu1 %v1467_v13 }
 0x267   :  { %v1416_v44 = vmul.f32 %v1412_v27, %v3784_v53  ;;  %v1403_v48 = vpop.permute.xlu1 %1402  ;;  %1567 = vmatprep.mubr.f32.mxu0 %v1453_v21  ;;  %1597 = vmatprep.mubr.f32.mxu1 %v1471_v49 }
 0x268   :  { %v1418_v38 = vsub.f32 %v1390_v63, %v1414_v47  ;;  %v1411_v50 = vmul.f32 %v1403_v48, %v1143_v43 }
 0x269   :  { %v1420_v53 = vsub.f32 %v1392_v1, %v1416_v44 }
 0x26a   :  { %v1415_v24 = vmul.f32 %v1411_v50, %v3787_v22  ;;  %1568 = vmatmul.mubr.f32.gmra.mrb[2].mxu0 %v1452_v4  ;;  %v1892_v57 = vpack.c.bf16 %v1418_v38, %v1417_v35  ;;  %1598 = vmatmul.mubr.f32.gmra.mrb[2].mxu1 %v1470_v20  ;;  %v1458_v22 = vld [vmem:[%s3946_s3 + $0x48] sm:$0xff] }
 0x26b   :  { %1572 = vmatprep.mubr.f32.mxu0 %v1456_v52  ;;  %1848 = vmatprep.mubr.msk.f32.mxu1 %vm1473_vm4, %v1451_v12 }
 0x26c   :  { %v1419_v17 = vsub.f32 %v1391_v56, %v1415_v24  ;;  %1893 = vmatprep.subr.bf16.mxu1 %v1892_v57 }
 0x26d   :  { %1895 = vmatpush3.bf16.msra.mxu1 %v1892_v57 }
 0x26e   :  { %1573 = vmatmul.mubr.f32.gmra.mrb[4].mxu0 %v1455_v11  ;;  %v1896_v45 = vpack.c.bf16 %v1420_v53, %v1419_v17 }
 0x26f   :  { %1577 = vmatprep.mubr.f32.mxu0 %v1459_v31 }
 0x270   :  { %1897 = vmatprep.subr.bf16.mxu1 %v1896_v45 }
 0x271   :  { %1899 = vmatpush3.bf16.msra.mxu1 %v1896_v45 }
 0x272   :  { %1578 = vmatmul.mubr.f32.gmra.mrb[6].mxu0 %v1458_v22 }
 0x273   :  { %1582 = vmatprep.mubr.f32.mxu0 %v1462_v3 }
 0x274   :  { %1849 = vmatmul.mubr.msk.f32.vlgmr.msra.gmra.mrb[4].mxu1 %vm1473_vm4, %v1454_v23 }
 0x275   :  { %1851 = vmatprep.mubr.msk.f32.mxu1 %vm1473_vm4, %v1457_v9 }
 0x276   :  { %1583 = vmatmul.mubr.f32.gmra.mrb[8].mxu0 %v1461_v26 }
 0x277   :  { %1587 = vmatprep.mubr.f32.mxu0 %v1465_v59 }
 0x278   :  { %1852 = vmatmul.mubr.msk.f32.gmra.mrb[6].mxu1 %vm1473_vm4, %v1460_v25 }
 0x279   :  { %1854 = vmatprep.mubr.msk.f32.mxu1 %vm1473_vm4, %v1463_v8 }
 0x27a   :  { %1588 = vmatmul.mubr.f32.gmra.mrb[10].mxu0 %v1464_v14 }
 0x27c   :  { %1855 = vmatmul.mubr.msk.f32.gmra.mrb[8].mxu1 %vm1473_vm4, %v1466_v7 }
 0x27d   :  { %1857 = vmatprep.mubr.msk.f32.mxu1 %vm1473_vm4, %v1469_v30 }
 0x280   :  { %1858 = vmatmul.mubr.msk.f32.gmra.mrb[10].mxu1 %vm1473_vm4, %v1472_v51 }
 0x339   :  { %v1804_v15 = vpop.f32.mrb[0].mxu0  ;;  %v1822_v37 = vpop.f32.mrb[0].mxu1 }
 0x33a   :  { %v1805_v55 = vpop.f32.mrb[1].mxu0  ;;  %v1823_v10 = vpop.f32.mrb[1].mxu1 }
 0x33b   :  { %v1806_v29 = vadd.f32 %v1805_v55, %v1804_v15  ;;  %v1824_v35 = vadd.f32 %v1823_v10, %v1822_v37 }
 0x33d   :  { %v1807_v61 = vpop.f32.mrb[2].mxu0  ;;  %v1825_v0 = vpop.f32.mrb[2].mxu1 }
 0x33e   :  { %v1808_v54 = vpop.f32.mrb[3].mxu0  ;;  %v1826_v6 = vpop.f32.mrb[3].mxu1 }
 0x33f   :  { %v1809_v41 = vadd.f32 %v1808_v54, %v1807_v61  ;;  %v1827_v58 = vadd.f32 %v1826_v6, %v1825_v0 }
 0x341   :  { %v1810_v5 = vpop.f32.mrb[4].mxu0 }
 0x342   :  { %v1811_v16 = vpop.f32.mrb[5].mxu0 }
 0x343   :  { %v1812_v36 = vadd.f32 %v1811_v16, %v1810_v5 }
 0x345   :  { %v1813_v39 = vpop.f32.mrb[6].mxu0 }
 0x346   :  { %v1814_v40 = vpop.f32.mrb[7].mxu0 }
 0x347   :  { %v1850_v28 = vpop.f32.mrb[4].mxu1  ;;  %v1815_v18 = vadd.f32 %v1814_v40, %v1813_v39 }
 0x348   :  { %v1675_v33 = vadd.f32 %v1850_v28, %v1809_v41  ;;  %v1669_v2 = vpop.f32.mrb[5].mxu1 }
 0x349   :  { %v1670_v62 = vadd.f32 %v1806_v29, %v1669_v2  ;;  %v1816_v46 = vpop.f32.mrb[8].mxu0 }
 0x34a   :  { %1709 = vst [vmem:[%s3947_s4 + $0x8] sm:$0xff] %v1675_v33  ;;  %v1817_v32 = vpop.f32.mrb[9].mxu0 }
 0x34b   :  { %1708 = vst [vmem:[%s3947_s4] sm:$0xff] %v1670_v62  ;;  %v1853_v42 = vpop.f32.mrb[6].mxu1  ;;  %v1818_v60 = vadd.f32 %v1817_v32, %v1816_v46 }
 0x34c   :  { %v1685_v13 = vadd.f32 %v1853_v42, %v1815_v18  ;;  %v1679_v34 = vpop.f32.mrb[7].mxu1 }
 0x34d   :  { %v1680_v19 = vadd.f32 %v1812_v36, %v1679_v34  ;;  %v1819_v21 = vpop.f32.mrb[10].mxu0 }
 0x34e   :  { %1711 = vst [vmem:[%s3947_s4 + $0x18] sm:$0xff] %v1685_v13  ;;  %v1820_v49 = vpop.f32.mrb[11].mxu0 }
 0x34f   :  { %1710 = vst [vmem:[%s3947_s4 + $0x10] sm:$0xff] %v1680_v19  ;;  %v1821_v27 = vadd.f32 %v1820_v49, %v1819_v21  ;;  %v1856_v63 = vpop.f32.mrb[8].mxu1 }
 0x350   :  { %v1689_v47 = vpop.f32.mrb[9].mxu1 }
 0x351   :  { %v1695_v43 = vadd.f32 %v1856_v63, %v1821_v27  ;;  %v1690_v1 = vadd.f32 %v1818_v60, %v1689_v47 }
 0x353   :  { %1713 = vst [vmem:[%s3947_s4 + $0x28] sm:$0xff] %v1695_v43  ;;  %1712 = vst [vmem:[%s3947_s4 + $0x20] sm:$0xff] %v1690_v1  ;;  %v1859_v44 = vpop.f32.mrb[10].mxu1 }
 0x354   :  { %v1705_v48 = vadd.f32 %v1859_v44, %v1827_v58  ;;  %v1699_v4 = vpop.f32.mrb[11].mxu1 }
 0x355   :  { %v1700_v20 = vadd.f32 %v1824_v35, %v1699_v4 }
 0x356   :  { %1715 = vst [vmem:[%s3947_s4 + $0x38] sm:$0xff] %v1705_v48 }
 0x357   :  { %1714 = vst [vmem:[%s3947_s4 + $0x30] sm:$0xff] %v1700_v20 }

</bundles_post_ra>
